<compile_context>
chip_gen: v5e
topology: v5e:2x2
jax: 0.10.0
libtpu: 0.0.40
codegen_flags: <defaults>
</compile_context>

<pallas_src>
import functools

import jax
import jax.numpy as jnp
from jax.experimental import pallas as pl
from jax.experimental.pallas import tpu as pltpu


def _round_up(x, m):
    return (x + m - 1) // m * m


def _fused_stem_pool_kernel(slab_ref, wT_ref, edge_ref, out_ref, *, rows, width, c_in):
    """One grid step = one (image, row-slab) pair: in-VMEM im2col + matmul + ReLU + pool-sum.

    slab_ref: (1, 1, LS)    bf16  channel-planar padded row slab (1 guard lane at the front)
    wT_ref:   (C_pad, K)    bf16  K = 9*c_in + 1, last column holds the bias
    edge_ref: (2, M)        bf16  row 0: 0 where col==0 ; row 1: 0 where col==W-1
    out_ref:  (1, 1, C_pad) f32   per-image accumulator, resident across the slab axis
    """
    s = pl.program_id(1)
    n_slabs = pl.num_programs(1)
    m = rows * width                    # output pixels handled by this slab
    plane = (rows + 2) * width          # lanes per input-channel plane (incl. 1-row halos)

    @pl.when(s == 0)
    def _init():
        out_ref[...] = jnp.zeros_like(out_ref)

    left = edge_ref[0:1, :]             # (1, M): zero out the dw=0 tap at image column 0
    right = edge_ref[1:2, :]            # (1, M): zero out the dw=2 tap at image column W-1

    # ---- in-kernel im2col: 9*c_in shifted (1, M) lane slices of the slab ----------------
    taps = []
    for ci in range(c_in):
        for dh in range(3):
            for dw in range(3):
                start = 1 + ci * plane + dh * width + (dw - 1)   # static lane offset
                piece = slab_ref[0, :, pl.ds(start, m)]          # (1, M) bf16
                if dw == 0:
                    piece = piece * left
                elif dw == 2:
                    piece = piece * right
                taps.append(piece)
    taps.append(jnp.ones((1, m), dtype=jnp.bfloat16))            # ones row -> bias column
    patches = jnp.concatenate(taps, axis=0)                      # (K, M) bf16

    # ---- conv-as-matmul on the MXU (f32 accumulation), ReLU, partial spatial sum ---------
    feat = jnp.dot(wT_ref[...], patches, preferred_element_type=jnp.float32)  # (C_pad, M)
    feat = jnp.maximum(feat, 0.0)
    out_ref[...] += jnp.sum(feat, axis=1)[None, None, :]

    @pl.when(s == n_slabs - 1)
    def _fin():
        # AdaptiveAvgPool2d((1,1)): divide the accumulated sum by H*W.
        out_ref[...] = out_ref[...] * (1.0 / (m * n_slabs))


def mixupnet_forward(x_nchw, w_conv, b_conv, *, rows_per_slab=None, target_pixels=8192):
    """x_nchw: (N, 3, H, W) float32. Returns (N, C_feat) float32."""
    N, C_in, H, W = x_nchw.shape
    C_feat = w_conv.shape[0]
    C_pad = _round_up(max(C_feat, 128), 128)     # lane-dense output channels
    K = 9 * C_in + 1                             # 27 taps + folded bias column

    # rows per slab: a divisor of H, targeting ~target_pixels spatial positions per grid step
    # so the ~0.35us per-grid-step overhead stays amortized.
    if rows_per_slab is None:
        rows_per_slab = 1
        for r in range(1, H + 1):
            if H % r == 0 and r * W <= target_pixels:
                rows_per_slab = r
    R = int(rows_per_slab)
    if H % R != 0:
        raise ValueError(f"rows_per_slab={R} must divide H={H}")
    n_slabs = H // R
    M = R * W
    plane = (R + 2) * W
    LS = _round_up(C_in * plane + 2, 128)        # +2 guard lanes for the dw=0 / dw=2 overhang

    # ---- glue (cheap, ~raw-image-sized): channel-planar row slabs with 1-row halo --------
    xp = jnp.pad(x_nchw, ((0, 0), (0, 0), (1, 1), (0, 0)))                 # (N, C, H+2, W)
    slabs = jnp.stack([xp[:, :, s * R:s * R + R + 2, :] for s in range(n_slabs)], axis=1)
    slabs = slabs.reshape(N * n_slabs, 1, C_in * plane)
    slabs = jnp.pad(slabs, ((0, 0), (0, 0), (1, LS - C_in * plane - 1)))   # front/back guards
    slabs = slabs.astype(jnp.bfloat16)                                     # (N*n_slabs, 1, LS)

    # Weight: (C_feat, C_in, 3, 3) -> (C_pad, 27+1); tap order (ci, dh, dw); last col = bias.
    wt = w_conv.reshape(C_feat, 9 * C_in)
    wt = jnp.concatenate([wt, b_conv.reshape(C_feat, 1)], axis=1)
    wt = jnp.pad(wt, ((0, C_pad - C_feat), (0, 0))).astype(jnp.bfloat16)   # (C_pad, K)

    # Precomputed W-boundary masks (avoids in-kernel iota/mod).
    col = jnp.arange(M, dtype=jnp.int32) % W
    edge = jnp.stack([(col != 0), (col != W - 1)]).astype(jnp.bfloat16)    # (2, M)

    kernel = functools.partial(_fused_stem_pool_kernel, rows=R, width=W, c_in=C_in)

    flops = 2 * N * H * W * K * C_pad
    bytes_accessed = slabs.size * 2 + wt.size * 2 + edge.size * 2 + N * C_pad * 4

    # Explicit VMEM budget (double-buffered slab + patches + f32 feature tile + weights);
    # capped well below v7x's 64 MiB physical VMEM.
    vmem_bytes = 2 * 8 * LS * 2 + 32 * M * 2 + 2 * C_pad * M * 4 + C_pad * K * 2 + (1 << 20)
    vmem_limit = int(min(max(vmem_bytes, 16 * 1024 * 1024), 48 * 1024 * 1024))

    out = pl.pallas_call(
        kernel,
        out_shape=jax.ShapeDtypeStruct((N, 1, C_pad), jnp.float32),
        grid=(N, n_slabs),
        in_specs=[
            pl.BlockSpec((1, 1, LS), lambda n, s: (n * n_slabs + s, 0, 0)),
            pl.BlockSpec((C_pad, K), lambda n, s: (0, 0)),
            pl.BlockSpec((2, M), lambda n, s: (0, 0)),
        ],
        # Per-image output block, resident across the slab (reduction) axis.
        out_specs=pl.BlockSpec((1, 1, C_pad), lambda n, s: (n, 0, 0)),
        compiler_params=pltpu.CompilerParams(
            dimension_semantics=("parallel", "arbitrary"),
            vmem_limit_bytes=vmem_limit),
        cost_estimate=pl.CostEstimate(
            flops=flops, transcendentals=0, bytes_accessed=bytes_accessed),
    )(slabs, wt, edge)
    return out[:, 0, :C_feat]


if __name__ == "__main__":
    # Small shapes consistent with the module: batch=2, in_channel=3, spatial=16x16.
    N, C_in, H, W = 2, 3, 16, 16
    C_feat = 64

    key = jax.random.PRNGKey(0)
    kx, kw, kb = jax.random.split(key, 3)
    x = jax.random.normal(kx, (N, C_in, H, W), dtype=jnp.float32)
    # Deterministic synthetic backbone parameters (3x3 conv, 3 -> C_feat).
    w_conv = jax.random.normal(kw, (C_feat, C_in, 3, 3), dtype=jnp.float32) * 0.1
    b_conv = jax.random.normal(kb, (C_feat,), dtype=jnp.float32) * 0.1

    # rows_per_slab=8 exercises the multi-slab spatial accumulation path (2 slabs / image).
    out = jax.block_until_ready(mixupnet_forward(x, w_conv, b_conv, rows_per_slab=8))
    assert out.shape == (N, C_feat), out.shape

    # Pure-JAX f32 reference (kernel streams bf16 operands -> modest tolerance).
    conv = jax.lax.conv_general_dilated(
        x, w_conv, window_strides=(1, 1), padding="SAME",
        dimension_numbers=("NCHW", "OIHW", "NCHW"))
    ref = jnp.maximum(conv + b_conv[None, :, None, None], 0.0).mean(axis=(2, 3))
    err = float(jnp.max(jnp.abs(out - ref)))
    assert jnp.allclose(out, ref, atol=3e-2, rtol=3e-2), err

    # Also exercise the auto slab-size path (single slab per image here).
    out2 = jax.block_until_ready(mixupnet_forward(x, w_conv, b_conv))
    assert jnp.allclose(out2, ref, atol=3e-2, rtol=3e-2), float(jnp.max(jnp.abs(out2 - ref)))

    print("KERNEL_OK")
</pallas_src>

<mosaic_0001>
module attributes {stable_mosaic.version = 11 : i64} {
  func.func @_fused_stem_pool_kernel(%arg0: i32, %arg1: i32, %arg2: memref<1x1x512xbf16, #tpu.memory_space<vmem>>, %arg3: memref<128x28xbf16, #tpu.memory_space<vmem>>, %arg4: memref<2x128xbf16, #tpu.memory_space<vmem>>, %arg5: memref<1x1x128xf32, #tpu.memory_space<vmem>>) attributes {dimension_semantics = [#tpu.dimension_semantics<parallel>, #tpu.dimension_semantics<arbitrary>], iteration_bounds = array<i64: 2, 2>, scalar_prefetch = 0 : i64, scratch_operands = 0 : i64, tpu.core_type = #tpu.core_type<tc>, window_params = [{transform_indices = @transform_0, window_bounds = array<i64: 1, 1, 512>}, {pipeline_mode = #tpu.pipeline_mode<synchronous>, transform_indices = @transform_1, window_bounds = array<i64: 128, 28>}, {pipeline_mode = #tpu.pipeline_mode<synchronous>, transform_indices = @transform_2, window_bounds = array<i64: 2, 128>}, {transform_indices = @transform_3, window_bounds = array<i64: 1, 1, 128>}]} {
    %c0_i32 = arith.constant 0 : i32
    %0 = arith.cmpi eq, %arg1, %c0_i32 : i32
    %1 = arith.extui %0 : i1 to i32
    %c0_i32_0 = arith.constant 0 : i32
    %2 = arith.cmpi ne, %1, %c0_i32_0 : i32
    scf.if %2 {
      %cst_71 = arith.constant 0.000000e+00 : f32
      %93 = vector.broadcast %cst_71 : f32 to vector<1x1x128xf32>
      %c0_72 = arith.constant 0 : index
      %c0_73 = arith.constant 0 : index
      %c0_74 = arith.constant 0 : index
      %94 = vector.load %arg5[%c0_72, %c0_73, %c0_74] : memref<1x1x128xf32, #tpu.memory_space<vmem>>, vector<1x1x128xf32>
      tpu.vector_store %arg5[%c0_72, %c0_73, %c0_74], %93 {strides = array<i32>} : memref<1x1x128xf32, #tpu.memory_space<vmem>>, vector<1x1x128xf32>,
    } else {
    }
    %c0 = arith.constant 0 : index
    %c0_1 = arith.constant 0 : index
    %3 = vector.load %arg4[%c0, %c0_1] : memref<2x128xbf16, #tpu.memory_space<vmem>>, vector<1x128xbf16>
    %c1 = arith.constant 1 : index
    %c0_2 = arith.constant 0 : index
    %4 = vector.load %arg4[%c1, %c0_2] : memref<2x128xbf16, #tpu.memory_space<vmem>>, vector<1x128xbf16>
    %c0_3 = arith.constant 0 : index
    %c0_4 = arith.constant 0 : index
    %c0_5 = arith.constant 0 : index
    %5 = vector.load %arg2[%c0_3, %c0_4, %c0_5] : memref<1x1x512xbf16, #tpu.memory_space<vmem>>, vector<1x1x128xbf16>
    %6 = vector.shape_cast %5 : vector<1x1x128xbf16> to vector<1x128xbf16>
    %7 = arith.mulf %6, %3 : vector<1x128xbf16>
    %c0_6 = arith.constant 0 : index
    %c0_7 = arith.constant 0 : index
    %c1_8 = arith.constant 1 : index
    %8 = vector.load %arg2[%c0_6, %c0_7, %c1_8] : memref<1x1x512xbf16, #tpu.memory_space<vmem>>, vector<1x1x128xbf16>
    %9 = vector.shape_cast %8 : vector<1x1x128xbf16> to vector<1x128xbf16>
    %c0_9 = arith.constant 0 : index
    %c0_10 = arith.constant 0 : index
    %c2 = arith.constant 2 : index
    %10 = vector.load %arg2[%c0_9, %c0_10, %c2] : memref<1x1x512xbf16, #tpu.memory_space<vmem>>, vector<1x1x128xbf16>
    %11 = vector.shape_cast %10 : vector<1x1x128xbf16> to vector<1x128xbf16>
    %12 = arith.mulf %11, %4 : vector<1x128xbf16>
    %c0_11 = arith.constant 0 : index
    %c0_12 = arith.constant 0 : index
    %c16 = arith.constant 16 : index
    %13 = vector.load %arg2[%c0_11, %c0_12, %c16] : memref<1x1x512xbf16, #tpu.memory_space<vmem>>, vector<1x1x128xbf16>
    %14 = vector.shape_cast %13 : vector<1x1x128xbf16> to vector<1x128xbf16>
    %15 = arith.mulf %14, %3 : vector<1x128xbf16>
    %c0_13 = arith.constant 0 : index
    %c0_14 = arith.constant 0 : index
    %c17 = arith.constant 17 : index
    %16 = vector.load %arg2[%c0_13, %c0_14, %c17] : memref<1x1x512xbf16, #tpu.memory_space<vmem>>, vector<1x1x128xbf16>
    %17 = vector.shape_cast %16 : vector<1x1x128xbf16> to vector<1x128xbf16>
    %c0_15 = arith.constant 0 : index
    %c0_16 = arith.constant 0 : index
    %c18 = arith.constant 18 : index
    %18 = vector.load %arg2[%c0_15, %c0_16, %c18] : memref<1x1x512xbf16, #tpu.memory_space<vmem>>, vector<1x1x128xbf16>
    %19 = vector.shape_cast %18 : vector<1x1x128xbf16> to vector<1x128xbf16>
    %20 = arith.mulf %19, %4 : vector<1x128xbf16>
    %c0_17 = arith.constant 0 : index
    %c0_18 = arith.constant 0 : index
    %c32 = arith.constant 32 : index
    %21 = vector.load %arg2[%c0_17, %c0_18, %c32] : memref<1x1x512xbf16, #tpu.memory_space<vmem>>, vector<1x1x128xbf16>
    %22 = vector.shape_cast %21 : vector<1x1x128xbf16> to vector<1x128xbf16>
    %23 = arith.mulf %22, %3 : vector<1x128xbf16>
    %c0_19 = arith.constant 0 : index
    %c0_20 = arith.constant 0 : index
    %c33 = arith.constant 33 : index
    %24 = vector.load %arg2[%c0_19, %c0_20, %c33] : memref<1x1x512xbf16, #tpu.memory_space<vmem>>, vector<1x1x128xbf16>
    %25 = vector.shape_cast %24 : vector<1x1x128xbf16> to vector<1x128xbf16>
    %c0_21 = arith.constant 0 : index
    %c0_22 = arith.constant 0 : index
    %c34 = arith.constant 34 : index
    %26 = vector.load %arg2[%c0_21, %c0_22, %c34] : memref<1x1x512xbf16, #tpu.memory_space<vmem>>, vector<1x1x128xbf16>
    %27 = vector.shape_cast %26 : vector<1x1x128xbf16> to vector<1x128xbf16>
    %28 = arith.mulf %27, %4 : vector<1x128xbf16>
    %c0_23 = arith.constant 0 : index
    %c0_24 = arith.constant 0 : index
    %c160 = arith.constant 160 : index
    %29 = vector.load %arg2[%c0_23, %c0_24, %c160] : memref<1x1x512xbf16, #tpu.memory_space<vmem>>, vector<1x1x128xbf16>
    %30 = vector.shape_cast %29 : vector<1x1x128xbf16> to vector<1x128xbf16>
    %31 = arith.mulf %30, %3 : vector<1x128xbf16>
    %c0_25 = arith.constant 0 : index
    %c0_26 = arith.constant 0 : index
    %c161 = arith.constant 161 : index
    %32 = vector.load %arg2[%c0_25, %c0_26, %c161] : memref<1x1x512xbf16, #tpu.memory_space<vmem>>, vector<1x1x128xbf16>
    %33 = vector.shape_cast %32 : vector<1x1x128xbf16> to vector<1x128xbf16>
    %c0_27 = arith.constant 0 : index
    %c0_28 = arith.constant 0 : index
    %c162 = arith.constant 162 : index
    %34 = vector.load %arg2[%c0_27, %c0_28, %c162] : memref<1x1x512xbf16, #tpu.memory_space<vmem>>, vector<1x1x128xbf16>
    %35 = vector.shape_cast %34 : vector<1x1x128xbf16> to vector<1x128xbf16>
    %36 = arith.mulf %35, %4 : vector<1x128xbf16>
    %c0_29 = arith.constant 0 : index
    %c0_30 = arith.constant 0 : index
    %c176 = arith.constant 176 : index
    %37 = vector.load %arg2[%c0_29, %c0_30, %c176] : memref<1x1x512xbf16, #tpu.memory_space<vmem>>, vector<1x1x128xbf16>
    %38 = vector.shape_cast %37 : vector<1x1x128xbf16> to vector<1x128xbf16>
    %39 = arith.mulf %38, %3 : vector<1x128xbf16>
    %c0_31 = arith.constant 0 : index
    %c0_32 = arith.constant 0 : index
    %c177 = arith.constant 177 : index
    %40 = vector.load %arg2[%c0_31, %c0_32, %c177] : memref<1x1x512xbf16, #tpu.memory_space<vmem>>, vector<1x1x128xbf16>
    %41 = vector.shape_cast %40 : vector<1x1x128xbf16> to vector<1x128xbf16>
    %c0_33 = arith.constant 0 : index
    %c0_34 = arith.constant 0 : index
    %c178 = arith.constant 178 : index
    %42 = vector.load %arg2[%c0_33, %c0_34, %c178] : memref<1x1x512xbf16, #tpu.memory_space<vmem>>, vector<1x1x128xbf16>
    %43 = vector.shape_cast %42 : vector<1x1x128xbf16> to vector<1x128xbf16>
    %44 = arith.mulf %43, %4 : vector<1x128xbf16>
    %c0_35 = arith.constant 0 : index
    %c0_36 = arith.constant 0 : index
    %c192 = arith.constant 192 : index
    %45 = vector.load %arg2[%c0_35, %c0_36, %c192] : memref<1x1x512xbf16, #tpu.memory_space<vmem>>, vector<1x1x128xbf16>
    %46 = vector.shape_cast %45 : vector<1x1x128xbf16> to vector<1x128xbf16>
    %47 = arith.mulf %46, %3 : vector<1x128xbf16>
    %c0_37 = arith.constant 0 : index
    %c0_38 = arith.constant 0 : index
    %c193 = arith.constant 193 : index
    %48 = vector.load %arg2[%c0_37, %c0_38, %c193] : memref<1x1x512xbf16, #tpu.memory_space<vmem>>, vector<1x1x128xbf16>
    %49 = vector.shape_cast %48 : vector<1x1x128xbf16> to vector<1x128xbf16>
    %c0_39 = arith.constant 0 : index
    %c0_40 = arith.constant 0 : index
    %c194 = arith.constant 194 : index
    %50 = vector.load %arg2[%c0_39, %c0_40, %c194] : memref<1x1x512xbf16, #tpu.memory_space<vmem>>, vector<1x1x128xbf16>
    %51 = vector.shape_cast %50 : vector<1x1x128xbf16> to vector<1x128xbf16>
    %52 = arith.mulf %51, %4 : vector<1x128xbf16>
    %c0_41 = arith.constant 0 : index
    %c0_42 = arith.constant 0 : index
    %c320 = arith.constant 320 : index
    %53 = vector.load %arg2[%c0_41, %c0_42, %c320] : memref<1x1x512xbf16, #tpu.memory_space<vmem>>, vector<1x1x128xbf16>
    %54 = vector.shape_cast %53 : vector<1x1x128xbf16> to vector<1x128xbf16>
    %55 = arith.mulf %54, %3 : vector<1x128xbf16>
    %c0_43 = arith.constant 0 : index
    %c0_44 = arith.constant 0 : index
    %c321 = arith.constant 321 : index
    %56 = vector.load %arg2[%c0_43, %c0_44, %c321] : memref<1x1x512xbf16, #tpu.memory_space<vmem>>, vector<1x1x128xbf16>
    %57 = vector.shape_cast %56 : vector<1x1x128xbf16> to vector<1x128xbf16>
    %c0_45 = arith.constant 0 : index
    %c0_46 = arith.constant 0 : index
    %c322 = arith.constant 322 : index
    %58 = vector.load %arg2[%c0_45, %c0_46, %c322] : memref<1x1x512xbf16, #tpu.memory_space<vmem>>, vector<1x1x128xbf16>
    %59 = vector.shape_cast %58 : vector<1x1x128xbf16> to vector<1x128xbf16>
    %60 = arith.mulf %59, %4 : vector<1x128xbf16>
    %c0_47 = arith.constant 0 : index
    %c0_48 = arith.constant 0 : index
    %c336 = arith.constant 336 : index
    %61 = vector.load %arg2[%c0_47, %c0_48, %c336] : memref<1x1x512xbf16, #tpu.memory_space<vmem>>, vector<1x1x128xbf16>
    %62 = vector.shape_cast %61 : vector<1x1x128xbf16> to vector<1x128xbf16>
    %63 = arith.mulf %62, %3 : vector<1x128xbf16>
    %c0_49 = arith.constant 0 : index
    %c0_50 = arith.constant 0 : index
    %c337 = arith.constant 337 : index
    %64 = vector.load %arg2[%c0_49, %c0_50, %c337] : memref<1x1x512xbf16, #tpu.memory_space<vmem>>, vector<1x1x128xbf16>
    %65 = vector.shape_cast %64 : vector<1x1x128xbf16> to vector<1x128xbf16>
    %c0_51 = arith.constant 0 : index
    %c0_52 = arith.constant 0 : index
    %c338 = arith.constant 338 : index
    %66 = vector.load %arg2[%c0_51, %c0_52, %c338] : memref<1x1x512xbf16, #tpu.memory_space<vmem>>, vector<1x1x128xbf16>
    %67 = vector.shape_cast %66 : vector<1x1x128xbf16> to vector<1x128xbf16>
    %68 = arith.mulf %67, %4 : vector<1x128xbf16>
    %c0_53 = arith.constant 0 : index
    %c0_54 = arith.constant 0 : index
    %c352 = arith.constant 352 : index
    %69 = vector.load %arg2[%c0_53, %c0_54, %c352] : memref<1x1x512xbf16, #tpu.memory_space<vmem>>, vector<1x1x128xbf16>
    %70 = vector.shape_cast %69 : vector<1x1x128xbf16> to vector<1x128xbf16>
    %71 = arith.mulf %70, %3 : vector<1x128xbf16>
    %c0_55 = arith.constant 0 : index
    %c0_56 = arith.constant 0 : index
    %c353 = arith.constant 353 : index
    %72 = vector.load %arg2[%c0_55, %c0_56, %c353] : memref<1x1x512xbf16, #tpu.memory_space<vmem>>, vector<1x1x128xbf16>
    %73 = vector.shape_cast %72 : vector<1x1x128xbf16> to vector<1x128xbf16>
    %c0_57 = arith.constant 0 : index
    %c0_58 = arith.constant 0 : index
    %c354 = arith.constant 354 : index
    %74 = vector.load %arg2[%c0_57, %c0_58, %c354] : memref<1x1x512xbf16, #tpu.memory_space<vmem>>, vector<1x1x128xbf16>
    %75 = vector.shape_cast %74 : vector<1x1x128xbf16> to vector<1x128xbf16>
    %76 = arith.mulf %75, %4 : vector<1x128xbf16>
    %cst = arith.constant 1.000000e+00 : bf16
    %77 = vector.broadcast %cst : bf16 to vector<1x128xbf16>
    %78 = tpu.concatenate %7, %9, %12, %15, %17, %20, %23, %25, %28, %31, %33, %36, %39, %41, %44, %47 in 0 : vector<1x128xbf16>, vector<1x128xbf16>, vector<1x128xbf16>, vector<1x128xbf16>, vector<1x128xbf16>, vector<1x128xbf16>, vector<1x128xbf16>, vector<1x128xbf16>, vector<1x128xbf16>, vector<1x128xbf16>, vector<1x128xbf16>, vector<1x128xbf16>, vector<1x128xbf16>, vector<1x128xbf16>, vector<1x128xbf16>, vector<1x128xbf16> -> vector<16x128xbf16>
    %79 = tpu.concatenate %49, %52, %55, %57, %60, %63, %65, %68, %71, %73, %76, %77 in 0 : vector<1x128xbf16>, vector<1x128xbf16>, vector<1x128xbf16>, vector<1x128xbf16>, vector<1x128xbf16>, vector<1x128xbf16>, vector<1x128xbf16>, vector<1x128xbf16>, vector<1x128xbf16>, vector<1x128xbf16>, vector<1x128xbf16>, vector<1x128xbf16> -> vector<12x128xbf16>
    %80 = tpu.concatenate %78, %79 in 0 : vector<16x128xbf16>, vector<12x128xbf16> -> vector<28x128xbf16>
    %c0_59 = arith.constant 0 : index
    %c0_60 = arith.constant 0 : index
    %81 = vector.load %arg3[%c0_59, %c0_60] : memref<128x28xbf16, #tpu.memory_space<vmem>>, vector<128x28xbf16>
    %cst_61 = arith.constant dense<0.000000e+00> : vector<128x128xf32>
    %82 = tpu.matmul %81, %80, %cst_61 {dimension_numbers = #tpu.dot_dimension_numbers<[1], [0], [0], [1], [0, 0, 1, 1], [], []>} : vector<128x28xbf16>, vector<28x128xbf16>, vector<128x128xf32> -> vector<128x128xf32>
    %cst_62 = arith.constant 0.000000e+00 : f32
    %83 = vector.broadcast %cst_62 : f32 to vector<128x128xf32>
    %84 = arith.maximumf %82, %83 : vector<128x128xf32>
    %c0_63 = arith.constant 0 : index
    %c0_64 = arith.constant 0 : index
    %c0_65 = arith.constant 0 : index
    %85 = vector.load %arg5[%c0_63, %c0_64, %c0_65] : memref<1x1x128xf32, #tpu.memory_space<vmem>>, vector<1x1x128xf32>
    %cst_66 = arith.constant dense<0.000000e+00> : vector<128xf32>
    %86 = vector.multi_reduction <add>, %84, %cst_66 [1] : vector<128x128xf32> to vector<128xf32>
    %87 = vector.shape_cast %86 : vector<128xf32> to vector<1x1x128xf32>
    %88 = arith.addf %85, %87 : vector<1x1x128xf32>
    %c0_67 = arith.constant 0 : index
    %c0_68 = arith.constant 0 : index
    %c0_69 = arith.constant 0 : index
    %89 = vector.load %arg5[%c0_67, %c0_68, %c0_69] : memref<1x1x128xf32, #tpu.memory_space<vmem>>, vector<1x1x128xf32>
    tpu.vector_store %arg5[%c0_67, %c0_68, %c0_69], %88 {strides = array<i32>} : memref<1x1x128xf32, #tpu.memory_space<vmem>>, vector<1x1x128xf32>,
    %c1_i32 = arith.constant 1 : i32
    %90 = arith.cmpi eq, %arg1, %c1_i32 : i32
    %91 = arith.extui %90 : i1 to i32
    %c0_i32_70 = arith.constant 0 : i32
    %92 = arith.cmpi ne, %91, %c0_i32_70 : i32
    scf.if %92 {
      %c0_71 = arith.constant 0 : index
      %c0_72 = arith.constant 0 : index
      %c0_73 = arith.constant 0 : index
      %93 = vector.load %arg5[%c0_71, %c0_72, %c0_73] : memref<1x1x128xf32, #tpu.memory_space<vmem>>, vector<1x1x128xf32>
      %cst_74 = arith.constant 3.906250e-03 : f32
      %94 = vector.broadcast %cst_74 : f32 to vector<1x1x128xf32>
      %95 = arith.mulf %93, %94 : vector<1x1x128xf32>
      %c0_75 = arith.constant 0 : index
      %c0_76 = arith.constant 0 : index
      %c0_77 = arith.constant 0 : index
      %96 = vector.load %arg5[%c0_75, %c0_76, %c0_77] : memref<1x1x128xf32, #tpu.memory_space<vmem>>, vector<1x1x128xf32>
      tpu.vector_store %arg5[%c0_75, %c0_76, %c0_77], %95 {strides = array<i32>} : memref<1x1x128xf32, #tpu.memory_space<vmem>>, vector<1x1x128xf32>,
    } else {
    }
    return
  }
  func.func @transform_0(%arg0: i32, %arg1: i32) -> (i32, i32, i32) {
    %c2_i32 = arith.constant 2 : i32
    %0 = arith.muli %arg0, %c2_i32 : i32
    %1 = arith.addi %0, %arg1 : i32
    %c0_i32 = arith.constant 0 : i32
    %c0_i32_0 = arith.constant 0 : i32
    %c0_i32_1 = arith.constant 0 : i32
    return %1, %c0_i32, %c0_i32_0 : i32, i32, i32
  }
  func.func @transform_1(%arg0: i32, %arg1: i32) -> (i32, i32) {
    %c0_i32 = arith.constant 0 : i32
    %c0_i32_0 = arith.constant 0 : i32
    %c0_i32_1 = arith.constant 0 : i32
    return %c0_i32, %c0_i32_0 : i32, i32
  }
  func.func @transform_2(%arg0: i32, %arg1: i32) -> (i32, i32) {
    %c0_i32 = arith.constant 0 : i32
    %c0_i32_0 = arith.constant 0 : i32
    %c0_i32_1 = arith.constant 0 : i32
    return %c0_i32, %c0_i32_0 : i32, i32
  }
  func.func @transform_3(%arg0: i32, %arg1: i32) -> (i32, i32, i32) {
    %c0_i32 = arith.constant 0 : i32
    %c0_i32_0 = arith.constant 0 : i32
    %c0_i32_1 = arith.constant 0 : i32
    return %arg0, %c0_i32, %c0_i32_0 : i32, i32, i32
  }
}

</mosaic_0001>

<bundles_post_ra>
// kernel: tpu_custom_call.1
= control target key start
LH: loop header
LB: loop body
LE: loop exit
PB: predicated region body
PF: predicated region fallthrough
CT: control target
= control target key end

     0   :  { %8 = vsyncpa [#allocation3], 0  ;;  %s2450_s0 = inlined_call_operand.vmem [shape: bf16[4,1,512], index: 0, kind: input, shape index: {}]   ;;  %s2451_s1 = inlined_call_operand.vmem [shape: bf16[128,28], index: 1, kind: input, shape index: {}]   ;;  %s2452_s2 = inlined_call_operand.vmem [shape: bf16[2,128], index: 2, kind: input, shape index: {}]   ;;  %s2453_s3 = inlined_call_operand.hbm [shape: f32[2,1,128], index: 3, kind: output, shape index: {}]  }
   0x1   :  { %10 = vsyncpa [#allocation3 + $0x1], 0  ;;  %s1970_s12 = smov 0   ;;  %s1972_s13 = smov 0  }
   0x2   :  { %s1974_s14 = smov 0   ;;  %s1976_s15 = smov 0  }
   0x3   :  { %s1978_s16 = smov 0   ;;  %s1980_s17 = smov 0  }
   0x4   :  { %s1982_s18 = smov 0   ;;  %s1984_s19 = smov 0  }
   0x5 LB: > { %s1597_s20 = sadd.s32 4294967295, %s1920_s19   ;;  %s1598_s21 = sadd.s32 4294967294, %s1920_s19   ;;  %s1920_s19 = sphi %s1984_s19, %s16_s19   ;;  %s1916_s18 = sphi %s1982_s18, %s2485_s18   ;;  %s1912_s17 = sphi %s1980_s17, %s2484_s17   ;;  %s1908_s16 = sphi %s1978_s16, %s2483_s16   ;;  %s1904_s15 = sphi %s1976_s15, %s2482_s15   ;;  %s1900_s14 = sphi %s1974_s14, %s2481_s14   ;;  %s1896_s13 = sphi %s1972_s13, %s2480_s13   ;;  %s1892_s12 = sphi %s1970_s12, %s2479_s12  }
   0x6   : > { %s25_s22 = sadd.s32 1, %s1912_s17  ;;  %s28_s23 = sadd.s32 1, %s1916_s18 }
   0x7   : > { %p26_p0 = scmp.ge.s32.totalorder %s25_s22, 2  ;;  %p117_p1 = scmp.ne.s32.totalorder %s1900_s14, %s1896_s13 }
   0x8   : > { %p118_p2 = scmp.eq.s32.totalorder %s1597_s20, 3  ;;  %p123_p4 = scmp.ne.s32.totalorder %s1896_s13, %s1892_s12 }
   0x9   : > { %s2487_s22 = smov (%p26_p0, %s25_s22), 0  ;;  %s2489_s23 = smov (!%p26_p0, %s28_s23), %s1916_s18 }
   0xa   : > { %p2019_p3 = por %p118_p2, %p117_p1  ;;  %p30_p5 = scmp.ge.s32.totalorder %s2489_s23, 2 }
   0xb   : > { %p124_p6 = scmp.eq.s32.totalorder %s1598_s21, 3  ;;  %p1603_p7 = scmp.ge.s32.totalorder %s1920_s19, 1 }
   0xc   : > { %p159_p8 = scmp.lt.s32.totalorder %s1920_s19, 5  ;;  %s2491_s23 = smov (%p30_p5, %s2489_s23), 0 }
   0xd   : > { %p2029_p9 = por %p124_p6, %p123_p4  ;;  %s104_s26 = ssub.s32 %s1916_s18, %s2491_s23 }
   0xe   : > { %p160_p10 = pnand %p1603_p7, %p159_p8  ;;  %s107_s27 = sadd.s32 1, %s1900_s14 }
   0xf   : > { %p105_p11 = scmp.eq.s32.totalorder %s104_s26, 0  ;;  %s181_s29 = sand.u32 (!%p160_p10), 1, %s1896_s13  }
  0x10   : > { %163 = sbr.rel (%p160_p10) target bundleno = 1110 (0x456), region = 32  ;;  %s1604_s30 = sshll.u32 (!%p160_p10), %s1908_s16, 1 }
  0x11   : > { %s2037_s28 = scalar_select %p105_p11, %s1900_s14, %s107_s27  }
  0x12   : > { %s184_s4 = sadd.s32 (!%p160_p10), %s1904_s15, %s1604_s30  ;;  %s2049_s9 = scalar_lea.vmem (!%p160_p10), [#allocation2], %s181_s29 }
  0x13   : > { %p185_p12 = scmp.lt.s32.totalorder (!%p160_p10), %s184_s4, 3  ;;  %p1606_p13 = scmp.ne.s32.totalorder (!%p160_p10), %s1904_s15, 0 }
  0x15   : > { %s2493_s4 = smov (!%p185_p12, %s184_s4), 3  ;;  %196 = sbr.rel (%p1606_p13) target bundleno = 28 (0x1c), region = 36 }
  0x16   : > { %s1605_s5 = sshll.u32 %s2493_s4, 2 }
  0x17   : > { %s2045_s8 = scalar_lea.vmem %s2450_s0, %s1605_s5 }
  0x1a   : > { %v1922_v0 = vmov 0.0  }
  0x1b   : > { %197 = vst [vmem:[%s2049_s9] sm:$0x1] %v1922_v0 }
  0x1c PF: > { %v198_v1 = vld [vmem:[%s2452_s2] sm:$0x1]  ;;  %s1923_s20 = smov 80   ;;  %s1924_s21 = smov 66   ;;  %v2072_v10 = vld [vmem:[%s2045_s8 + $0x1] sm:$0x3] }
  0x1d   : > { %v2057_v2 = vld [vmem:[%s2045_s8] sm:$0x3]  ;;  %v2059_v3 = vunpack.c.l.bf16 %v198_v1  ;;  %s1925_s26 = smov 98   ;;  %s1926_s27 = smov 82   ;;  %v342_v17 = vld [vmem:[%s2045_s8 + $0x2] sm:$0x3] }
  0x1e   : > { %411 = vst [vmem:[#allocation1] ss:$9 sm:$0xff] %v2057_v2  ;;  %s1927_s30 = smov 64   ;;  %s1928_s4 = smov 18   ;;  %vm2455_vm0 = vcmask 654336   ;;  %v2106_v33 = vunpack.c.l.bf16 %v342_v17  ;;  %vm332_vm1 = vcmask 539648   ;;  %v2124_v57 = vunpack.c.l.bf16 %v2057_v2 }
  0x1f   : > { %v207_v4 = vrot.slane %v2059_v3, 7  ;;  %358 = vrot.lane.b32.xlu1 %v2059_v3, %s1923_s20  ;;  %s1929_s5 = smov 2   ;;  %s1930_s6 = smov 16   ;;  %vm2454_vm2 = vcmask 523264   ;;  %vm225_vm3 = vcmask 130048   ;;  %vm374_vm4 = vcmask 670720  }
  0x20   : > { %s1931_s7 = smov 48   ;;  %s1932_s10 = smov 34   ;;  %vm251_vm5 = vcmask 261120   ;;  %vm2456_vm6 = vcmask 785408   ;;  %vm238_vm7 = vcmask 146432   ;;  %vm293_vm8 = vcmask 392192  }
  0x21   : > { %v208_v5 = vrot.slane %v207_v4, 2  ;;  %s1933_s11 = smov 32   ;;  %vm264_vm9 = vcmask 277504   ;;  %vm400_vm10 = vcmask 801792   ;;  %vm212_vm11 = vcmask 15360   ;;  %p1647_p0 = scmp.ne.s32.totalorder %s1904_s15, 1 }
  0x22   : > { %vm306_vm12 = vcmask 408576   ;;  %vm642_vm13 = vcmask 1040384   ;;  %vm643_vm14 = vsmask.f32 256  ;;  %vm422_vm15 = vcmask 1039360  }
  0x23   : > { %329 = vrot.lane.b32.xlu0 %v208_v5, %s1924_s21  ;;  %397 = vrot.lane.b32.xlu2 %v208_v5, %s1925_s26  ;;  %s1934_s21 = smov 50   ;;  %s1935_s26 = smov 112  }
  0x25   : > { %v412_v6 = vld [vmem:[#allocation1] sm:$0xff]  ;;  %v413_v7 = vld [vmem:[#allocation1 + $0x9] sm:$0xff] }
  0x26   : > { %459 = vst [vmem:[#allocation1 + $0x2] ss:$9 sm:$0xff] %v2057_v2  ;;  %v414_v28 = vshll.u32 %v412_v6, 16  ;;  %v416_v29 = vshll.u32 %v413_v7, 16 }
  0x27   : > { %371 = vrot.lane.b32.xlu1 %v208_v5, %s1926_s27  ;;  %s1936_s27 = smov 111  }
  0x28   : > { %v1768_v30 = vpack.i.bf16 %v416_v29, %v414_v28 }
  0x2b   : > { %316 = vrot.lane.b32.xlu0 %v2059_v3, %s1927_s30  ;;  %235 = vrot.lane.b32.xlu2 %v208_v5, %s1928_s4  ;;  %s1937_s4 = smov 96  }
  0x2d   : > { %v460_v8 = vld [vmem:[#allocation1] sm:$0xff]  ;;  %v462_v9 = vld [vmem:[#allocation1 + $0x9] sm:$0xff] }
  0x2e   : > { %503 = vst [vmem:[#allocation1] ss:$9 sm:$0xff] %v2057_v2 }
  0x2f   : > { %209 = vrot.lane.b32.xlu1 %v208_v5, %s1929_s5  ;;  %s1938_s5 = smov 127  }
  0x33   : > { %222 = vrot.lane.b32.xlu0 %v2059_v3, %s1930_s6  ;;  %290 = vrot.lane.b32.xlu2 %v2059_v3, %s1931_s7  ;;  %s1939_s6 = smov 1   ;;  %s1940_s7 = smov 113  }
  0x35   : > { %v2074_v11 = vld [vmem:[#allocation1] sm:$0xff]  ;;  %v2076_v12 = vld [vmem:[#allocation1 + $0x9] sm:$0xff] }
  0x36   : > { %551 = vst [vmem:[#allocation1 + $0x5] ss:$9 sm:$0xff] %v2072_v10 }
  0x37   : > { %261 = vrot.lane.b32.xlu1 %v208_v5, %s1932_s10  ;;  %s1941_s10 = smov 97  }
  0x3b   : > { %248 = vrot.lane.b32.xlu0 %v2059_v3, %s1933_s11  ;;  %s1942_s11 = smov 95  }
  0x3d   : > { %v2080_v13 = vld [vmem:[#allocation1] sm:$0xff]  ;;  %v2082_v14 = vld [vmem:[#allocation1 + $0x9] sm:$0xff] }
  0x3e   : > { %593 = vst [vmem:[#allocation1] ss:$9 sm:$0xff] %v2072_v10 }
  0x43   : > { %303 = vrot.lane.b32.xlu0 %v208_v5, %s1934_s21  ;;  %v2131_v5 = vunpack.c.l.bf16 %v2072_v10  ;;  %s1943_s21 = smov 110  }
  0x45   : > { %v2085_v15 = vld [vmem:[#allocation1] sm:$0xff]  ;;  %v2087_v16 = vld [vmem:[#allocation1 + $0x9] sm:$0xff] }
  0x46   : > { %709 = vst [vmem:[#allocation1] ss:$9 sm:$0xff] %v2072_v10 }
  0x4b   : > { %1769 = vrot.lane.b32.xlu0 %v1768_v30, %s1938_s5 }
  0x4d   : > { %v2091_v18 = vld [vmem:[#allocation1] sm:$0xff]  ;;  %v2093_v19 = vld [vmem:[#allocation1 + $0x9] sm:$0xff] }
  0x4e   : > { %746 = vst [vmem:[#allocation1] ss:$9 sm:$0xff] %v342_v17 }
  0x55   : > { %v2095_v20 = vld [vmem:[#allocation1] sm:$0xff]  ;;  %v2097_v21 = vld [vmem:[#allocation1 + $0x9] sm:$0xff] }
  0x56   : > { %791 = vst [vmem:[#allocation1 + $0x3] ss:$9 sm:$0xff] %v342_v17 }
  0x5d   : > { %v792_v22 = vld [vmem:[#allocation1] sm:$0xff]  ;;  %v794_v23 = vld [vmem:[#allocation1 + $0x9] sm:$0xff] }
  0x5e   : > { %832 = vst [vmem:[#allocation1] ss:$9 sm:$0xff] %v342_v17  ;;  %796 = vrot.lane.b32.xlu1 %v792_v22, %s1935_s26 }
  0x65   : > { %v833_v24 = vld [vmem:[#allocation1] sm:$0xff] }
  0x66   : > { %v835_v25 = vshll.u32 %v833_v24, 16  ;;  %464 = vrot.lane.b32.xlu1 %v460_v8, %s1936_s27 }
  0x68   : > { %v837_v26 = vrot.slane %v835_v25, 4 }
  0x6a   : > { %v1763_v27 = vpack.i.bf16 %v837_v26, %v2059_v3 }
  0x6c   : > { %1764 = vrot.lane.b32.xlu2 %v1763_v27, %s1937_s4 }
  0x74   : > { %798 = vrot.lane.b32.xlu2 %v794_v23, %s1935_s26 }
  0x7c   : > { %466 = vrot.lane.b32.xlu2 %v462_v9, %s1936_s27 }
  0x7d   : > { %v2128_v1 = vpop.permute.xlu2 %397 }
  0x85   : > { %v236_v29 = vpop.permute.xlu2 %235 }
  0x91   : > { %v359_v31 = vpop.permute.xlu1 %358 }
  0x92   : > { %v360_v32 = vrot.slane %v359_v31, 6 }
  0x94   : > { %v362_v34 = vsel %vm2455_vm0, %v360_v32, %v359_v31  ;;  %v834_v32 = vld [vmem:[#allocation1 + $0x9] sm:$0xff]  ;;  %vm786_vm0 = vcmask 924672  }
  0x95   : > { %v330_v35 = vpop.permute.xlu0 %329  ;;  %v364_v36 = vmul.f32 %v362_v34, %v2106_v33 }
  0x96   : > { %v331_v37 = vrot.slane %v330_v35, 6 }
  0x97   : > { %v366_v40 = vperm.slane %v364_v36, 0  ;;  %v367_v41 = vperm.slane %v364_v36, 2 }
  0x98   : > { %v2110_v38 = vsel %vm332_vm1, %v331_v37, %v330_v35  ;;  %vm2458_vm1 = vcmask 908288  }
  0x99   : > { %v2114_v39 = vmul.f32 %v2106_v33, %v2110_v38  ;;  %v370_v43 = vpack.c.bf16 %v367_v41, %v366_v40  ;;  %v372_v55 = vpop.permute.xlu1 %371  ;;  %v838_v40 = vshll.u32 %v834_v32, 16 }
  0x9a   : > { %v373_v60 = vrot.slane %v372_v55, 6 }
  0x9b   : > { %v770_v47 = vunpack.c.l.b16 %v370_v43  ;;  %v771_v48 = vunpack.c.h.b16 %v370_v43 }
  0x9c   : > { %v375_v6 = vsel %vm374_vm4, %v373_v60, %v372_v55  ;;  %vm2457_vm4 = vcmask 916480  }
  0x9d   : > { %v317_v42 = vpop.permute.xlu0 %316  ;;  %v772_v53 = vpack.c.b16 %v770_v47, %v770_v47  ;;  %v773_v54 = vpack.c.b16 %v771_v48, %v771_v48  ;;  %v377_v24 = vmul.f32 %v375_v6, %v2106_v33  ;;  %v840_v47 = vrot.slane %v838_v40, 4 }
  0x9e   : > { %v318_v44 = vrot.slane %v317_v42, 6 }
  0x9f   : > { %v775_v63 = vshll.u32 %v772_v53, 16  ;;  %v779_v0 = vshll.u32 %v773_v54, 16  ;;  %v379_v30 = vperm.slane %v377_v24, 0  ;;  %v380_v31 = vperm.slane %v377_v24, 2  ;;  %v291_v54 = vpop.permute.xlu2 %290 }
  0xa0   : > { %v2117_v45 = vsel %vm2454_vm2, %v318_v44, %v317_v42  ;;  %vm679_vm2 = vsmask.f32 4352 }
  0xa1   : > { %v344_v46 = vmul.f32 %v2106_v33, %v2117_v45  ;;  %v777_v9 = vrot.slane %v775_v63, 6  ;;  %v781_v17 = vrot.slane %v779_v0, 6  ;;  %v383_v41 = vpack.c.bf16 %v380_v31, %v379_v30  ;;  %v2151_v32 = vpop.permute.xlu1 %209 }
  0xa3   : > { %v346_v49 = vperm.slane %v344_v46, 0  ;;  %v347_v50 = vperm.slane %v344_v46, 2  ;;  %v1773_v27 = vpack.i.bf16 %v781_v17, %v777_v9  ;;  %v802_v48 = vunpack.c.l.b16 %v383_v41 }
  0xa4   : > { %v803_v53 = vunpack.c.h.b16 %v383_v41  ;;  %v335_v9 = vmul.f32 %v2110_v38, %v2131_v5  ;;  %v237_v17 = vrot.slane %v236_v29, 6 }
  0xa5   : > { %v2121_v51 = vpack.c.bf16 %v347_v50, %v346_v49  ;;  %v223_v52 = vpop.permute.xlu0 %222 }
  0xa6   : > { %v224_v56 = vrot.slane %v223_v52, 6  ;;  %v805_v60 = vpack.c.b16 %v803_v53, %v803_v53  ;;  %v338_v38 = vperm.slane %v335_v9, 2  ;;  %v399_v53 = vrot.slane %v2128_v1, 6 }
  0xa7   : > { %v734_v58 = vunpack.c.h.b16 %v2121_v51 }
  0xa8   : > { %v226_v59 = vsel %vm225_vm3, %v224_v56, %v223_v52  ;;  %v811_v63 = vshll.u32 %v805_v60, 16  ;;  %vm2206_vm3 = vmand %vm642_vm13, %vm643_vm14  ;;  %vm670_vm14 = vsmask.f32 3328 }
  0xa9   : > { %v228_v61 = vmul.f32 %v226_v59, %v2124_v57  ;;  %v736_v62 = vpack.c.b16 %v734_v58, %v734_v58  ;;  %v804_v59 = vpack.c.b16 %v802_v48, %v802_v48 }
  0xab   : > { %v738_v4 = vrot.slane %v736_v62, 7  ;;  %v230_v2 = vperm.slane %v228_v61, 0  ;;  %v231_v7 = vperm.slane %v228_v61, 2  ;;  %v807_v62 = vshll.u32 %v804_v59, 16  ;;  %v262_v59 = vpop.permute.xlu1 %261 }
  0xad   : > { %v249_v8 = vpop.permute.xlu0 %248  ;;  %741 = vrot.lane.b32.xlu0 %v738_v4, %s1939_s6  ;;  %v234_v25 = vpack.c.bf16 %v231_v7, %v230_v2  ;;  %v809_v7 = vrot.slane %v807_v62, 5 }
  0xae   : > { %v250_v22 = vrot.slane %v249_v8, 6 }
  0xaf   : > { %v439_v35 = vunpack.c.l.b16 %v234_v25  ;;  %v440_v36 = vunpack.c.h.b16 %v234_v25 }
  0xb0   : > { %v252_v23 = vsel %vm251_vm5, %v250_v22, %v249_v8  ;;  %v813_v8 = vrot.slane %v811_v63, 5  ;;  %v292_v22 = vrot.slane %v291_v54, 6  ;;  %vm743_vm5 = vcmask 7168  }
  0xb1   : > { %v276_v26 = vmul.f32 %v2131_v5, %v252_v23  ;;  %v441_v43 = vpack.c.b16 %v439_v35, %v439_v35  ;;  %v442_v44 = vpack.c.b16 %v440_v36, %v440_v36  ;;  %v254_v6 = vmul.f32 %v252_v23, %v2124_v57 }
  0xb2   : > { %v1793_v23 = vpack.i.bf16 %v813_v8, %v809_v7  ;;  %v337_v35 = vperm.slane %v335_v9, 0  ;;  %v239_v36 = vsel %vm238_vm7, %v237_v17, %v236_v29  ;;  %v733_v29 = vunpack.c.l.b16 %v2121_v51 }
  0xb3   : > { %v278_v10 = vperm.slane %v276_v26, 0  ;;  %v279_v28 = vperm.slane %v276_v26, 2  ;;  %v444_v50 = vshll.u32 %v441_v43, 16  ;;  %v448_v52 = vshll.u32 %v442_v44, 16 }
  0xb4   : > { %v256_v25 = vperm.slane %v254_v6, 0  ;;  %v257_v26 = vperm.slane %v254_v6, 2  ;;  %v241_v44 = vmul.f32 %v239_v36, %v2124_v57  ;;  %v735_v63 = vpack.c.b16 %v733_v29, %v733_v29 }
  0xb5   : > { %v2136_v34 = vpack.c.bf16 %v279_v28, %v278_v10  ;;  %1774 = vrot.lane.b32.xlu0 %v1773_v27, %s1940_s7  ;;  %v446_v56 = vrot.slane %v444_v50, 7  ;;  %v450_v58 = vrot.slane %v448_v52, 7  ;;  %v506_v10 = vshll.u32 %v2074_v11, 16 }
  0xb6   : > { %v509_v28 = vshll.u32 %v2076_v12, 16  ;;  %v260_v40 = vpack.c.bf16 %v257_v26, %v256_v25  ;;  %v244_v60 = vperm.slane %v241_v44, 2  ;;  %v354_v7 = vperm.slane %v2114_v39, 2 }
  0xb7   : > { %v531_v37 = vunpack.c.l.b16 %v2136_v34  ;;  %v1783_v61 = vpack.i.bf16 %v450_v58, %v446_v56  ;;  %v532_v48 = vunpack.c.h.b16 %v2136_v34  ;;  %v263_v34 = vrot.slane %v262_v59, 6 }
  0xb8   : > { %v511_v43 = vrot.slane %v509_v28, 5  ;;  %v491_v52 = vunpack.c.l.b16 %v260_v40  ;;  %v401_v17 = vsel %vm400_vm10, %v399_v53, %v2128_v1  ;;  %v737_v26 = vrot.slane %v735_v63, 7 }
  0xb9   : > { %v533_v42 = vpack.c.b16 %v531_v37, %v531_v37  ;;  %v294_v37 = vsel %vm293_vm8, %v292_v22, %v291_v54  ;;  %v2161_v6 = vsel %vm264_vm9, %v263_v34, %v262_v59  ;;  %v211_v1 = vrot.slane %v2151_v32, 6 }
  0xba   : > { %v296_v11 = vmul.f32 %v294_v37, %v2131_v5  ;;  %v283_v9 = vmul.f32 %v2131_v5, %v2161_v6  ;;  %vm651_vm7 = vcmask 1041408   ;;  %vm652_vm8 = vsmask.f32 1280 }
  0xbb   : > { %v536_v46 = vshll.u32 %v533_v42, 16  ;;  %v508_v42 = vrot.slane %v506_v10, 5  ;;  %vm660_vm9 = vcmask 1042432   ;;  %vm661_vm10 = vsmask.f32 2304 }
  0xbc   : > { %v298_v56 = vperm.slane %v296_v11, 0  ;;  %v299_v58 = vperm.slane %v296_v11, 2  ;;  %v285_v28 = vperm.slane %v283_v9, 0 }
  0xbd   : > { %v538_v49 = vrot.slane %v536_v46, 4  ;;  %v1798_v54 = vpack.i.bf16 %v511_v43, %v508_v42 }
  0xbe   : > { %v2165_v8 = vpack.c.bf16 %v299_v58, %v298_v56 }
  0xbf   : > { %v1778_v55 = vpack.i.bf16 %v538_v49, %v840_v47  ;;  %v341_v47 = vpack.c.bf16 %v338_v38, %v337_v35  ;;  %v403_v35 = vmul.f32 %v401_v17, %v2106_v33 }
  0xc1   : > { %1779 = vrot.lane.b32.xlu0 %v1778_v55, %s1937_s4  ;;  %v243_v55 = vperm.slane %v241_v44, 0  ;;  %v715_v62 = vunpack.c.l.b16 %v341_v47  ;;  %v716_v51 = vunpack.c.h.b16 %v341_v47  ;;  %v405_v44 = vperm.slane %v403_v35, 0 }
  0xc3   : > { %v247_v22 = vpack.c.bf16 %v244_v60, %v243_v55  ;;  %v717_v25 = vpack.c.b16 %v715_v62, %v715_v62  ;;  %v718_v10 = vpack.c.b16 %v716_v51, %v716_v51 }
  0xc5   : > { %v471_v36 = vunpack.c.l.b16 %v247_v22  ;;  %v472_v37 = vunpack.c.h.b16 %v247_v22  ;;  %v720_v42 = vshll.u32 %v717_v25, 16 }
  0xc6   : > { %v2140_v0 = vpop.permute.xlu2 %1764 }
  0xc7   : > { %v1766_v4 = vunpack.i.l.bf16 %v2140_v0  ;;  %v474_v47 = vpack.c.b16 %v472_v37, %v472_v37 }
  0xc9   : > { %v386_v2 = vrot.slane %v1766_v4, 6  ;;  %1784 = vrot.lane.b32.xlu0 %v1783_v61, %s1935_s26  ;;  %v534_v61 = vpack.c.b16 %v532_v48, %v532_v48  ;;  %v480_v58 = vshll.u32 %v474_v47, 16  ;;  %s1944_s26 = smov 94   ;;  %v596_v47 = vshll.u32 %v2085_v15, 16 }
  0xcb   : > { %v388_v24 = vsel %vm2456_vm6, %v386_v2, %v1766_v4  ;;  %v493_v4 = vpack.c.b16 %v491_v52, %v491_v52  ;;  %v353_v2 = vperm.slane %v2114_v39, 0  ;;  %v581_v39 = vunpack.c.l.b16 %v2165_v8 }
  0xcc   : > { %v390_v27 = vmul.f32 %v388_v24, %v2106_v33  ;;  %v540_v24 = vshll.u32 %v534_v61, 16  ;;  %v406_v33 = vperm.slane %v403_v35, 2  ;;  %v482_v51 = vrot.slane %v480_v58, 6 }
  0xcd   : > { %v583_v11 = vpack.c.b16 %v581_v39, %v581_v39 }
  0xce   : > { %v392_v30 = vperm.slane %v390_v27, 0  ;;  %v393_v31 = vperm.slane %v390_v27, 2  ;;  %v495_v27 = vrot.slane %v493_v4, 5  ;;  %v542_v38 = vrot.slane %v540_v24, 4 }
  0xcf   : > { %v585_v55 = vrot.slane %v583_v11, 2  ;;  %v409_v59 = vpack.c.bf16 %v406_v33, %v405_v44 }
  0xd0   : > { %v396_v41 = vpack.c.bf16 %v393_v31, %v392_v30  ;;  %v286_v30 = vperm.slane %v283_v9, 2  ;;  %v357_v31 = vpack.c.bf16 %v354_v7, %v353_v2 }
  0xd1   : > { %1794 = vrot.lane.b32.xlu0 %v1793_v23, %s1936_s27  ;;  %v492_v23 = vunpack.c.h.b16 %v260_v40  ;;  %v723_v40 = vshll.u32 %v718_v10, 16  ;;  %v850_v9 = vunpack.c.h.b16 %v409_v59  ;;  %v849_v17 = vunpack.c.l.b16 %v409_v59  ;;  %s1945_s27 = smov 126  }
  0xd2   : > { %v823_v12 = vunpack.c.h.b16 %v396_v41  ;;  %v822_v46 = vunpack.c.l.b16 %v396_v41  ;;  %v289_v43 = vpack.c.bf16 %v286_v30, %v285_v28  ;;  %v758_v29 = vunpack.c.l.b16 %v357_v31 }
  0xd3   : > { %v494_v41 = vpack.c.b16 %v492_v23, %v492_v23  ;;  %v851_v23 = vpack.c.b16 %v849_v17, %v849_v17  ;;  %v267_v30 = vmul.f32 %v2161_v6, %v2124_v57 }
  0xd4   : > { %v825_v49 = vpack.c.b16 %v823_v12, %v823_v12  ;;  %v824_v50 = vpack.c.b16 %v822_v46, %v822_v46  ;;  %v213_v12 = vsel %vm212_vm11, %v211_v1, %v2151_v32  ;;  %v473_v46 = vpack.c.b16 %v471_v36, %v471_v36  ;;  %vm2242_vm11 = vmand %vm651_vm7, %vm652_vm8 }
  0xd5   : > { %v496_v48 = vrot.slane %v494_v41, 5  ;;  %v562_v52 = vunpack.c.l.b16 %v289_v43  ;;  %v563_v53 = vunpack.c.h.b16 %v289_v43  ;;  %v760_v32 = vpack.c.b16 %v758_v29, %v758_v29 }
  0xd6   : > { %828 = vrot.lane.b32.xlu2 %v825_v49, %s1941_s10  ;;  %826 = vrot.lane.b32.xlu1 %v824_v50, %s1941_s10  ;;  %v1788_v49 = vpack.i.bf16 %v723_v40, %v720_v42  ;;  %v759_v50 = vunpack.c.h.b16 %v357_v31  ;;  %v476_v56 = vshll.u32 %v473_v46, 16  ;;  %v269_v36 = vperm.slane %v267_v30, 0 }
  0xd7   : > { %v564_v61 = vpack.c.b16 %v562_v52, %v562_v52  ;;  %v565_v62 = vpack.c.b16 %v563_v53, %v563_v53  ;;  %v762_v7 = vrot.slane %v760_v32, 6  ;;  %v270_v37 = vperm.slane %v267_v30, 2 }
  0xd8   : > { %v761_v60 = vpack.c.b16 %v759_v50, %v759_v50  ;;  %v478_v4 = vrot.slane %v476_v56, 6  ;;  %v582_v50 = vunpack.c.h.b16 %v2165_v8  ;;  %v598_v29 = vrot.slane %v596_v47, 2  ;;  %v199_v8 = vld [vmem:[%s2045_s8] sm:$0x1]  ;;  %s1947_s8 = smov 78  }
  0xd9   : > { %1799 = vrot.lane.b32.xlu0 %v1798_v54, %s1942_s11  ;;  %v215_v54 = vmul.f32 %v213_v12, %v2124_v57  ;;  %v567_v22 = vshll.u32 %v564_v61, 16  ;;  %v571_v24 = vshll.u32 %v565_v62, 16  ;;  %v273_v43 = vpack.c.bf16 %v270_v37, %v269_v36  ;;  %v304_v12 = vpop.permute.xlu0 %303 }
  0xda   : > { %v763_v2 = vrot.slane %v761_v60, 6  ;;  %v305_v46 = vrot.slane %v304_v12, 6  ;;  %v200_v60 = vunpack.c.l.bf16 %v199_v8  ;;  %vm678_vm8 = vcmask 1044480  }
  0xdb   : > { %v217_v34 = vperm.slane %v215_v54, 0  ;;  %v218_v63 = vperm.slane %v215_v54, 2  ;;  %v569_v10 = vrot.slane %v567_v22, 3  ;;  %v573_v28 = vrot.slane %v571_v24, 3 }
  0xdc   : > { %v520_v57 = vunpack.c.l.b16 %v273_v43  ;;  %v521_v6 = vunpack.c.h.b16 %v273_v43  ;;  %v584_v54 = vpack.c.b16 %v582_v50, %v582_v50  ;;  %v752_v43 = vshll.u32 %v2097_v21, 16 }
  0xdd   : > { %v221_v25 = vpack.c.bf16 %v218_v63, %v217_v34  ;;  %v1813_v1 = vpack.i.bf16 %v573_v28, %v569_v10  ;;  %v202_v34 = vmul.f32 %v2059_v3, %v200_v60 }
  0xde   : > { %739 = vrot.lane.b32.xlu2 %v737_v26, %s1939_s6  ;;  %497 = vrot.lane.b32.xlu1 %v495_v27, %s1937_s4  ;;  %v1808_v26 = vpack.i.bf16 %v482_v51, %v478_v4  ;;  %v852_v27 = vpack.c.b16 %v850_v9, %v850_v9  ;;  %v522_v33 = vpack.c.b16 %v520_v57, %v520_v57  ;;  %v586_v58 = vrot.slane %v584_v54, 2 }
  0xdf   : > { %v426_v31 = vunpack.c.l.b16 %v221_v25  ;;  %v427_v35 = vunpack.c.h.b16 %v221_v25  ;;  %v523_v11 = vpack.c.b16 %v521_v6, %v521_v6  ;;  %v203_v9 = vpack.c.bf16 %v202_v34, %v202_v34 }
  0xe0   : > { %v854_v39 = vrot.slane %v852_v27, 3 }
  0xe1   : > { %545 = vrot.lane.b32.xlu0 %v542_v38, %s1937_s4  ;;  %v853_v38 = vrot.slane %v851_v23, 3  ;;  %v428_v41 = vpack.c.b16 %v426_v31, %v426_v31  ;;  %v429_v42 = vpack.c.b16 %v427_v35, %v427_v35  ;;  %v1770_v59 = vpop.permute.xlu0 %1769 }
  0xe2   : > { %v1772_v32 = vunpack.i.h.bf16 %v1770_v59  ;;  %v1771_v61 = vunpack.i.l.bf16 %v1770_v59 }
  0xe3   : > { %v430_v40 = vrot.slane %v428_v41, 7  ;;  %v431_v44 = vrot.slane %v429_v42, 7 }
  0xe6   : > { %499 = vrot.lane.b32.xlu2 %v496_v48, %s1937_s4  ;;  %1789 = vrot.lane.b32.xlu1 %v1788_v49, %s1938_s5  ;;  %v599_v48 = vshll.u32 %v2087_v16, 16  ;;  %v307_v49 = vsel %vm306_vm12, %v305_v46, %v304_v12  ;;  %v2195_v16 = vpop.permute.xlu2 %798  ;;  %s1946_s4 = smov 79   ;;  %vm669_vm12 = vcmask 1043456  }
  0xe7   : > { %v309_v53 = vmul.f32 %v307_v49, %v2131_v5 }
  0xe8   : > { %v601_v52 = vrot.slane %v599_v48, 2 }
  0xe9   : > { %587 = vrot.lane.b32.xlu0 %v585_v55, %s1923_s20  ;;  %v311_v56 = vperm.slane %v309_v53, 0  ;;  %v312_v15 = vperm.slane %v309_v53, 2 }
  0xea   : > { %v1803_v55 = vpack.i.bf16 %v601_v52, %v598_v29 }
  0xee   : > { %766 = vrot.lane.b32.xlu2 %v763_v2, %s1938_s5  ;;  %764 = vrot.lane.b32.xlu1 %v762_v7, %s1938_s5  ;;  %v467_v4 = vpop.permute.xlu2 %466  ;;  %v423_v7 = vsel %vm422_vm15, %v1771_v61, %v1772_v32 }
  0xef   : > { %v2216_v24 = vsel %vm2206_vm3, %v203_v9, %v423_v7 }
  0xf1   : > { %1809 = vrot.lane.b32.xlu0 %v1808_v26, %s1943_s21 }
  0xf6   : > { %857 = vrot.lane.b32.xlu2 %v854_v39, %s1942_s11  ;;  %855 = vrot.lane.b32.xlu1 %v853_v38, %s1942_s11  ;;  %v322_v38 = vmul.f32 %v2117_v45, %v2131_v5  ;;  %v754_v45 = vrot.slane %v752_v43, 7  ;;  %v1767_v43 = vunpack.i.h.bf16 %v2140_v0 }
  0xf8   : > { %v324_v42 = vperm.slane %v322_v38, 0 }
  0xf9   : > { %1814 = vrot.lane.b32.xlu0 %v1813_v1, %s1944_s26 }
  0xfe   : > { %432 = vrot.lane.b32.xlu1 %v430_v40, %s1945_s27  ;;  %434 = vrot.lane.b32.xlu2 %v431_v44, %s1945_s27  ;;  %v325_v40 = vperm.slane %v322_v38, 2 }
 0x100   : > { %v328_v44 = vpack.c.bf16 %v325_v40, %v324_v42 }
 0x102   : > { %v623_v21 = vunpack.c.l.b16 %v328_v44  ;;  %v624_v48 = vunpack.c.h.b16 %v328_v44 }
 0x104   : > { %v626_v34 = vpack.c.b16 %v624_v48, %v624_v48 }
 0x106   : > { %524 = vrot.lane.b32.xlu1 %v522_v33, %s1944_s26  ;;  %526 = vrot.lane.b32.xlu2 %v523_v11, %s1944_s26  ;;  %v749_v33 = vshll.u32 %v2095_v20, 16  ;;  %v632_v42 = vshll.u32 %v626_v34, 16 }
 0x108   : > { %v751_v53 = vrot.slane %v749_v33, 7 }
 0x10e   : > { %556 = vrot.lane.b32.xlu1 %v2080_v13, %s1942_s11  ;;  %558 = vrot.lane.b32.xlu2 %v2082_v14, %s1942_s11  ;;  %v2198_v13 = vpop.permute.xlu1 %796  ;;  %v2200_v14 = vpack.c.bf16 %v312_v15, %v311_v56 }
 0x110   : > { %v610_v62 = vunpack.c.l.b16 %v2200_v14  ;;  %v611_v0 = vunpack.c.h.b16 %v2200_v14 }
 0x112   : > { %v612_v63 = vpack.c.b16 %v610_v62, %v610_v62  ;;  %v625_v62 = vpack.c.b16 %v623_v21, %v623_v21 }
 0x114   : > { %v614_v3 = vrot.slane %v612_v63, 1 }
 0x116   : > { %589 = vrot.lane.b32.xlu1 %v586_v58, %s1923_s20  ;;  %1804 = vrot.lane.b32.xlu2 %v1803_v55, %s1946_s4  ;;  %v465_v51 = vpop.permute.xlu1 %464  ;;  %s1948_s20 = smov 63  }
 0x117   : > { %v2212_v22 = vsel %vm2458_vm1, %v465_v51, %v467_v4  ;;  %616 = vrot.lane.b32.xlu0 %v614_v3, %s1947_s8  ;;  %vm2273_vm1 = vmand %vm678_vm8, %vm679_vm2  ;;  %vm2471_vm2 = vcmask 908288  }
 0x11f   : > { %v742_v17 = vpop.permute.xlu0 %741 }
 0x127   : > { %v2219_v25 = vpop.permute.xlu0 %1774 }
 0x128   : > { %v1777_v50 = vunpack.i.h.bf16 %v2219_v25  ;;  %v1776_v56 = vunpack.i.l.bf16 %v2219_v25 }
 0x12a   : > { %v787_v7 = vsel %vm786_vm0, %v1776_v56, %v1777_v50  ;;  %vm516_vm0 = vcmask 777216  }
 0x130   : > { %v2223_v27 = vpop.permute.xlu2 %828 }
 0x133   : > { %v2221_v26 = vpop.permute.xlu0 %1779 }
 0x134   : > { %v1781_v63 = vunpack.i.l.bf16 %v2221_v26 }
 0x138   : > { %v740_v31 = vpop.permute.xlu2 %739 }
 0x139   : > { %v744_v46 = vsel %vm743_vm5, %v740_v31, %v742_v17  ;;  %vm2253_vm5 = vmand %vm660_vm9, %vm661_vm10 }
 0x13a   : > { %vm2266_vm10 = vmand %vm669_vm12, %vm670_vm14 }
 0x13b   : > { %v1785_v23 = vpop.permute.xlu0 %1784 }
 0x13c   : > { %v1787_v10 = vunpack.i.h.bf16 %v1785_v23  ;;  %v1786_v28 = vunpack.i.l.bf16 %v1785_v23 }
 0x13e   : > { %v2226_v30 = vsel %vm2457_vm4, %v1786_v28, %v1787_v10  ;;  %vm830_vm4 = vcmask 793600  }
 0x140   : > { %v500_v1 = vpop.permute.xlu2 %499 }
 0x143   : > { %v1795_v35 = vpop.permute.xlu0 %1794 }
 0x144   : > { %v1797_v55 = vunpack.i.h.bf16 %v1795_v35  ;;  %v1796_v15 = vunpack.i.l.bf16 %v1795_v35 }
 0x146   : > { %v818_v9 = vsel %vm2471_vm2, %v1796_v15, %v1797_v55  ;;  %vm487_vm2 = vcmask 900096  }
 0x148   : > { %v2228_v39 = vpop.permute.xlu1 %826  ;;  %v767_v57 = vpop.permute.xlu2 %766 }
 0x149   : > { %v831_v40 = vsel %vm830_vm4, %v2228_v39, %v2223_v27  ;;  %vm436_vm4 = vcmask 1031168  }
 0x14b   : > { %v2232_v36 = vpop.permute.xlu0 %1799 }
 0x150   : > { %v498_v37 = vpop.permute.xlu1 %497  ;;  %v858_v17 = vpop.permute.xlu2 %857 }
 0x151   : > { %v2235_v41 = vsel %vm2456_vm6, %v498_v37, %v500_v1  ;;  %vm688_vm6 = vsmask.f32 5376  ;;  %v628_v37 = vshll.u32 %v625_v62, 16 }
 0x153   : > { %v2239_v5 = vpop.permute.xlu0 %545  ;;  %v630_v33 = vrot.slane %v628_v37, 1 }
 0x158   : > { %v1790_v6 = vpop.permute.xlu1 %1789 }
 0x159   : > { %v1792_v11 = vunpack.i.h.bf16 %v1790_v6  ;;  %v1791_v12 = vunpack.i.l.bf16 %v1790_v6 }
 0x15b   : > { %v861_v49 = vsel %vm2206_vm3, %v2093_v19, %v1792_v11  ;;  %v729_v20 = vsel %vm422_vm15, %v1791_v12, %v1792_v11  ;;  %v2298_v28 = vpop.permute.xlu0 %587  ;;  %v435_v12 = vpop.permute.xlu2 %434 }
 0x15c   : > { %v868_v29 = vsel %vm642_vm13, %v861_v49, %v744_v46  ;;  %v860_v54 = vsel %vm2206_vm3, %v2091_v18, %v729_v20  ;;  %vm687_vm3 = vcmask 1045504   ;;  %v613_v49 = vpack.c.b16 %v611_v0, %v611_v0  ;;  %v1657_v0 = vld [vmem:[%s2451_s1 + $0x38] sm:$0xff] }
 0x15d   : > { %v871_v19 = vsel %vm2242_vm11, %v868_v29, %v754_v45  ;;  %v864_v58 = vsel %vm642_vm13, %v860_v54, %v740_v31  ;;  %vm2289_vm14 = vmand %vm687_vm3, %vm688_vm6  ;;  %vm2475_vm6 = vcmask 785408   ;;  %v634_v45 = vrot.slane %v632_v42, 1 }
 0x15e   : > { %v878_v59 = vsel %vm651_vm7, %v871_v19, %v767_v57  ;;  %v870_v51 = vsel %vm2242_vm11, %v864_v58, %v751_v53  ;;  %v1802_v20 = vunpack.i.h.bf16 %v2232_v36  ;;  %v615_v19 = vrot.slane %v613_v49, 1 }
 0x15f   : > { %v881_v18 = vsel %vm2253_vm5, %v878_v59, %v1777_v50  ;;  %v1818_v21 = vpack.i.bf16 %v634_v45, %v630_v33  ;;  %v1801_v50 = vunpack.i.l.bf16 %v2232_v36  ;;  %v1652_v33 = vld [vmem:[%s2451_s1 + $0x10] sm:$0xff]  ;;  %v1654_v45 = vld [vmem:[%s2451_s1 + $0x20] sm:$0xff] }
 0x160   : > { %v765_v60 = vpop.permute.xlu1 %764  ;;  %v888_v61 = vsel %vm660_vm9, %v881_v18, %v2195_v16 }
 0x161   : > { %v768_v4 = vsel %vm422_vm15, %v765_v60, %v767_v57  ;;  %v891_v2 = vsel %vm2266_vm10, %v888_v61, %v1797_v55  ;;  %vm2474_vm15 = vcmask 916480   ;;  %v845_v57 = vsel %vm2475_vm6, %v1767_v43, %v1781_v63 }
 0x162   : > { %v874_v3 = vsel %vm651_vm7, %v870_v51, %v768_v4  ;;  %v898_v23 = vsel %vm669_vm12, %v891_v2, %v2223_v27  ;;  %v800_v10 = vsel %vm2474_vm15, %v2198_v13, %v2195_v16  ;;  %v517_v58 = vsel %vm516_vm0, %v1801_v50, %v1802_v20 }
 0x163   : > { %v880_v31 = vsel %vm2253_vm5, %v874_v3, %v787_v7  ;;  %v901_v35 = vsel %vm2273_vm1, %v898_v23, %v1781_v63  ;;  %v1810_v48 = vpop.permute.xlu0 %1809  ;;  %v527_v36 = vpop.permute.xlu2 %526  ;;  %v1782_v60 = vunpack.i.h.bf16 %v2221_v26 }
 0x164   : > { %v884_v38 = vsel %vm660_vm9, %v880_v31, %v800_v10  ;;  %v908_v1 = vsel %vm678_vm8, %v901_v35, %v858_v17  ;;  %v1812_v29 = vunpack.i.h.bf16 %v1810_v48  ;;  %v1811_v53 = vunpack.i.l.bf16 %v1810_v48 }
 0x165   : > { %v911_v16 = vsel %vm2289_vm14, %v908_v1, 1065369472  ;;  %v890_v13 = vsel %vm2266_vm10, %v884_v38, %v818_v9 }
 0x166   : > { %916 = vrot.lane.b32.xlu2 %v911_v16, %s1948_s20  ;;  %v894_v44 = vsel %vm669_vm12, %v890_v13, %v831_v40  ;;  %v488_v15 = vsel %vm487_vm2, %v1811_v53, %v1812_v29  ;;  %vm1454_vm2 = vcmask 195712  }
 0x167   : > { %v900_v39 = vsel %vm2273_vm1, %v894_v44, %v845_v57 }
 0x168   : > { %v856_v6 = vpop.permute.xlu1 %855 }
 0x169   : > { %v859_v27 = vsel %vm516_vm0, %v856_v6, %v858_v17  ;;  %v1650_v6 = vld [vmem:[%s2451_s1] sm:$0xff] }
 0x16a   : > { %v904_v11 = vsel %vm678_vm8, %v900_v39, %v859_v27  ;;  %v1656_v27 = vld [vmem:[%s2451_s1 + $0x30] sm:$0xff]  ;;  %v1651_v39 = vld [vmem:[%s2451_s1 + $0x8] sm:$0xff] }
 0x16b   : > { %v910_v46 = vsel %vm2289_vm14, %v904_v11, 1065369472  ;;  %v1815_v62 = vpop.permute.xlu0 %1814  ;;  %v559_v4 = vpop.permute.xlu2 %558  ;;  %v1653_v11 = vld [vmem:[%s2451_s1 + $0x18] sm:$0xff] }
 0x16c   : > { %914 = vrot.lane.b32.xlu1 %v910_v46, %s1948_s20  ;;  %v1817_v63 = vunpack.i.h.bf16 %v1815_v62  ;;  %v1816_v26 = vunpack.i.l.bf16 %v1815_v62 }
 0x16e   : > { %1819 = vrot.lane.b32.xlu2 %v1818_v21, %s1927_s30 }
 0x170   : > { %v433_v54 = vpop.permute.xlu1 %432 }
 0x171   : > { %v437_v55 = vsel %vm436_vm4, %v433_v54, %v435_v12  ;;  %v1655_v12 = vld [vmem:[%s2451_s1 + $0x28] sm:$0xff]  ;;  %vm1450_vm4 = vcmask 130112  }
 0x172   : > { %v649_v14 = vsel %vm642_vm13, %v2216_v24, %v437_v55  ;;  %vm528_vm13 = vcmask 769024  }
 0x173   : > { %v654_v56 = vsel %vm2242_vm11, %v649_v14, %v2226_v30  ;;  %v578_v51 = vsel %vm528_vm13, %v1816_v26, %v1817_v63  ;;  %v1805_v9 = vpop.permute.xlu2 %1804  ;;  %vm2477_vm11 = vcmask 654336  }
 0x174   : > { %v658_v59 = vsel %vm651_vm7, %v654_v56, %v2212_v22  ;;  %618 = vrot.lane.b32.xlu1 %v615_v19, %s1947_s8  ;;  %vm2476_vm7 = vmmov %vm2475_vm6  ;;  %v1807_v23 = vunpack.i.h.bf16 %v1805_v9  ;;  %v1806_v32 = vunpack.i.l.bf16 %v1805_v9  ;;  %vm2478_vm6 = vcmask 523264  }
 0x175   : > { %v663_v18 = vsel %vm2253_vm5, %v658_v59, %v488_v15  ;;  %v547_v22 = vsel %vm2476_vm7, %v1782_v60, %v2239_v5  ;;  %vm697_vm5 = vsmask.f32 6400  ;;  %vm1462_vm7 = vcmask 326912  }
 0x176   : > { %v667_v24 = vsel %vm660_vm9, %v663_v18, %v2235_v41  ;;  %vm918_vm9 = vcmask 515072  }
 0x177   : > { %v672_v30 = vsel %vm2266_vm10, %v667_v24, %v517_v58  ;;  %vm706_vm10 = vsmask.f32 7424 }
 0x178   : > { %v525_v47 = vpop.permute.xlu1 %524 }
 0x179   : > { %v529_v61 = vsel %vm528_vm13, %v525_v47, %v527_v36  ;;  %vm1458_vm13 = vcmask 261312  }
 0x17a   : > { %v676_v34 = vsel %vm669_vm12, %v672_v30, %v529_v61  ;;  %vm696_vm12 = vcmask 1046528  }
 0x17b   : > { %v681_v52 = vsel %vm2273_vm1, %v676_v34, %v547_v22  ;;  %vm606_vm1 = vcmask 646144   ;;  %vm698_vm15 = vmand %vm696_vm12, %vm697_vm5  ;;  %vm1482_vm5 = vcmask 654912  }
 0x17c   : > { %v607_v25 = vsel %vm606_vm1, %v1806_v32, %v1807_v23  ;;  %vm1470_vm1 = vcmask 458112  }
 0x180   : > { %v557_v2 = vpop.permute.xlu1 %556 }
 0x181   : > { %v560_v41 = vsel %vm516_vm0, %v557_v2, %v559_v4 }
 0x182   : > { %v685_v8 = vsel %vm678_vm8, %v681_v52, %v560_v41  ;;  %vm705_vm8 = vcmask 1047552   ;;  %v1949_v41 = vmov 0  }
 0x183   : > { %v690_v7 = vsel %vm2289_vm14, %v685_v8, %v578_v51  ;;  %vm620_vm14 = vcmask 637952   ;;  %vm707_vm0 = vmand %vm705_vm8, %vm706_vm10  ;;  %1823 = vset.pattern.permute.xlu0 %v1949_v41  ;;  %1824 = vset.pattern.permute.xlu1 %v1949_v41  ;;  %vm1486_vm8 = vcmask 720512   ;;  %vm1490_vm10 = vcmask 786112  }
 0x184   : > { %1825 = vset.pattern.permute.xlu2 %v1949_v41 }
 0x188   : > { %v590_v17 = vpop.permute.xlu1 %589 }
 0x189   : > { %v592_v35 = vsel %vm2477_vm11, %v2298_v28, %v590_v17  ;;  %v617_v40 = vpop.permute.xlu0 %616  ;;  %vm1474_vm11 = vcmask 523712  }
 0x18a   : > { %v694_v1 = vsel %vm687_vm3, %v690_v7, %v592_v35 }
 0x18b   : > { %v699_v13 = vsel %vm698_vm15, %v694_v1, %v607_v25  ;;  %vm1498_vm15 = vcmask 917312  }
 0x1c0   : > { %v917_v5 = vpop.permute.xlu2 %916 }
 0x1c8   : > { %v1820_v38 = vpop.permute.xlu2 %1819 }
 0x1c9   : > { %v1822_v37 = vunpack.i.h.bf16 %v1820_v38  ;;  %v1821_v42 = vunpack.i.l.bf16 %v1820_v38 }
 0x1cb   : > { %v640_v44 = vsel %vm2478_vm6, %v1821_v42, %v1822_v37  ;;  %vm1506_vm6 = vcmask 1048512  }
 0x1de   : > { %v915_v3 = vpop.permute.xlu1 %914 }
 0x1df   : > { %v919_v10 = vsel %vm918_vm9, %v915_v3, %v917_v5  ;;  %vm1466_vm9 = vcmask 392512  }
 0x1e0   : > { %v1002_v31 = vsel %vm687_vm3, %v919_v10, 0  ;;  %vm976_vm3 = vcmask 228352  }
 0x1e1   : > { %1010 = vmatpush.bf16.msra.mxu0 %v1002_v31  ;;  %1658 = vmatpush.bf16.msra.mxu1 %v1002_v31 }
 0x1e2   : > { %1659 = vmatpush.bf16.msra.mxu2 %v1002_v31  ;;  %1660 = vmatpush.bf16.msra.mxu3 %v1002_v31 }
 0x1e6   : > { %v619_v16 = vpop.permute.xlu1 %618 }
 0x1e7   : > { %v621_v28 = vsel %vm620_vm14, %v617_v40, %v619_v16  ;;  %vm1494_vm14 = vcmask 851712  }
 0x1e8   : > { %v703_v43 = vsel %vm696_vm12, %v699_v13, %v621_v28  ;;  %vm1478_vm12 = vcmask 589312  }
 0x1e9   : > { %v708_v57 = vsel %vm707_vm0, %v703_v43, %v640_v44  ;;  %vm1502_vm0 = vcmask 982912  }
 0x1ea   : > { %1011 = vmatpush.bf16.msra.mxu0 %v708_v57  ;;  %1661 = vmatpush.bf16.msra.mxu1 %v708_v57 }
 0x1eb   : > { %1662 = vmatpush.bf16.msra.mxu2 %v708_v57  ;;  %1663 = vmatpush.bf16.msra.mxu3 %v708_v57 }
 0x1ed   : > { %1639 = vmatmul.msk.bf16.vlgmr.msra.gmra.mxu0 %vm976_vm3, %v1650_v6  ;;  %1641 = vmatmul.msk.bf16.vlgmr.msra.gmra.mxu1 %vm976_vm3, %v1652_v33 }
 0x1ee   : > { %1643 = vmatmul.msk.bf16.vlgmr.msra.gmra.mxu2 %vm976_vm3, %v1654_v45  ;;  %1645 = vmatmul.msk.bf16.vlgmr.msra.gmra.mxu3 %vm976_vm3, %v1656_v27 }
 0x1fd   : > { %1640 = vmatmul.msk.bf16.gmra.mxu0 %vm976_vm3, %v1651_v39  ;;  %1642 = vmatmul.msk.bf16.gmra.mxu1 %vm976_vm3, %v1653_v11 }
 0x1fe   : > { %1644 = vmatmul.msk.bf16.gmra.mxu2 %vm976_vm3, %v1655_v12  ;;  %1646 = vmatmul.msk.bf16.gmra.mxu3 %vm976_vm3, %v1657_v0 }
 0x26a   : > { %v1013_v46 = vpop.f32.mrf.mxu0  ;;  %v1023_v21 = vpop.f32.mrf.mxu1 }
 0x26b   : > { %v1053_v48 = vmax.f32 %v1013_v46, 0.0  ;;  %v1057_v49 = vmax.f32 %v1023_v21, 0.0 }
 0x26d   : > { %1070 = vadd.xlane.f32.xlu0 %v1053_v48 }
 0x271   : > { %v1033_v20 = vpop.f32.mrf.mxu2  ;;  %v1043_v54 = vpop.f32.mrf.mxu3 }
 0x272   : > { %v1015_v50 = vpop.f32.mrf.mxu0  ;;  %v1025_v29 = vpop.f32.mrf.mxu1  ;;  %v1061_v36 = vmax.f32 %v1033_v20, 0.0  ;;  %v1065_v4 = vmax.f32 %v1043_v54, 0.0 }
 0x273   : > { %v1054_v53 = vmax.f32 %v1015_v50, 0.0  ;;  %v1058_v55 = vmax.f32 %v1025_v29, 0.0 }
 0x275   : > { %1072 = vadd.xlane.f32.xlu1 %v1054_v53  ;;  %1078 = vadd.xlane.f32.xlu0 %v1057_v49 }
 0x279   : > { %v1035_v15 = vpop.f32.mrf.mxu2  ;;  %v1045_v58 = vpop.f32.mrf.mxu3 }
 0x27a   : > { %v1018_v14 = vpop.f32.mrf.mxu0  ;;  %v1028_v19 = vpop.f32.mrf.mxu1  ;;  %v1062_v52 = vmax.f32 %v1035_v15, 0.0  ;;  %v1066_v63 = vmax.f32 %v1045_v58, 0.0 }
 0x27b   : > { %v1055_v56 = vmax.f32 %v1018_v14, 0.0  ;;  %v1059_v61 = vmax.f32 %v1028_v19, 0.0 }
 0x27d   : > { %1074 = vadd.xlane.f32.xlu2 %v1055_v56  ;;  %1080 = vadd.xlane.f32.xlu1 %v1058_v55 }
 0x281   : > { %v1038_v30 = vpop.f32.mrf.mxu2  ;;  %v1048_v47 = vpop.f32.mrf.mxu3 }
 0x282   : > { %v1020_v59 = vpop.f32.mrf.mxu0  ;;  %v1030_v18 = vpop.f32.mrf.mxu1  ;;  %v1063_v62 = vmax.f32 %v1038_v30, 0.0  ;;  %v1067_v22 = vmax.f32 %v1048_v47, 0.0 }
 0x283   : > { %v1056_v60 = vmax.f32 %v1020_v59, 0.0  ;;  %v1060_v24 = vmax.f32 %v1030_v18, 0.0 }
 0x285   : > { %1076 = vadd.xlane.f32.xlu2 %v1056_v60  ;;  %1084 = vadd.xlane.f32.xlu0 %v1060_v24 }
 0x286   : > { %1086 = vadd.xlane.f32.xlu1 %v1061_v36 }
 0x289   : > { %v1040_v34 = vpop.f32.mrf.mxu2  ;;  %v1050_v51 = vpop.f32.mrf.mxu3 }
 0x28a   : > { %v1064_v26 = vmax.f32 %v1040_v34, 0.0  ;;  %v1068_v2 = vmax.f32 %v1050_v51, 0.0 }
 0x28d   : > { %1082 = vadd.xlane.f32.xlu2 %v1059_v61  ;;  %1090 = vadd.xlane.f32.xlu0 %v1063_v62 }
 0x28e   : > { %1098 = vadd.xlane.f32.xlu1 %v1067_v22 }
 0x295   : > { %1088 = vadd.xlane.f32.xlu2 %v1062_v52  ;;  %1096 = vadd.xlane.f32.xlu0 %v1066_v63 }
 0x296   : > { %1092 = vadd.xlane.f32.xlu1 %v1064_v26 }
 0x29d   : > { %1094 = vadd.xlane.f32.xlu2 %v1065_v4 }
 0x2a5   : > { %1100 = vadd.xlane.f32.xlu2 %v1068_v2 }
 0x2e0   : > { %v1071_v8 = vpop.xlane.xlu0 %1070 }
 0x2e1   : > { %v1118_v7 = vperm.slane %v1071_v8, 0  ;;  %v1119_v9 = vperm.slane %v1071_v8, 1  ;;  %v1120_v17 = vperm.slane %v1071_v8, 2  ;;  %v1121_v5 = vperm.slane %v1071_v8, 3 }
 0x2e2   : > { %v1122_v3 = vperm.slane %v1071_v8, 4  ;;  %v1123_v23 = vperm.slane %v1071_v8, 5  ;;  %v1124_v32 = vperm.slane %v1071_v8, 6  ;;  %v1125_v10 = vperm.slane %v1071_v8, 7 }
 0x2e3   : > { %1246 = vst [vmem:[#allocation1] ss:$9 sm:$0xff] %v1118_v7 }
 0x2e4   : > { %1248 = vst [vmem:[#allocation1 + $0x1] ss:$9 sm:$0xff] %v1119_v9 }
 0x2e5   : > { %1250 = vst [vmem:[#allocation1 + $0x2] ss:$9 sm:$0xff] %v1120_v17 }
 0x2e6   : > { %1252 = vst [vmem:[#allocation1 + $0x3] ss:$9 sm:$0xff] %v1121_v5 }
 0x2e7   : > { %1254 = vst [vmem:[#allocation1 + $0x4] ss:$9 sm:$0xff] %v1122_v3 }
 0x2e8   : > { %1256 = vst [vmem:[#allocation1 + $0x5] ss:$9 sm:$0xff] %v1123_v23  ;;  %v1073_v31 = vpop.xlane.xlu1 %1072  ;;  %v1079_v54 = vpop.xlane.xlu0 %1078 }
 0x2e9   : > { %1258 = vst [vmem:[#allocation1 + $0x6] ss:$9 sm:$0xff] %v1124_v32  ;;  %v1126_v35 = vperm.slane %v1073_v31, 0  ;;  %v1127_v38 = vperm.slane %v1073_v31, 1  ;;  %v1128_v25 = vperm.slane %v1073_v31, 2  ;;  %v1129_v37 = vperm.slane %v1073_v31, 3 }
 0x2ea   : > { %1260 = vst [vmem:[#allocation1 + $0x7] ss:$9 sm:$0xff] %v1125_v10  ;;  %v1130_v42 = vperm.slane %v1073_v31, 4  ;;  %v1131_v40 = vperm.slane %v1073_v31, 5  ;;  %v1132_v16 = vperm.slane %v1073_v31, 6  ;;  %v1133_v28 = vperm.slane %v1073_v31, 7 }
 0x2eb   : > { %v1150_v55 = vperm.slane %v1079_v54, 0  ;;  %v1151_v14 = vperm.slane %v1079_v54, 1  ;;  %v1152_v19 = vperm.slane %v1079_v54, 2  ;;  %v1153_v15 = vperm.slane %v1079_v54, 3 }
 0x2ec   : > { %v1154_v58 = vperm.slane %v1079_v54, 4  ;;  %v1155_v59 = vperm.slane %v1079_v54, 5  ;;  %v1156_v36 = vperm.slane %v1079_v54, 6  ;;  %v1157_v18 = vperm.slane %v1079_v54, 7 }
 0x2f0   : > { %v1075_v13 = vpop.xlane.xlu2 %1074  ;;  %v1081_v60 = vpop.xlane.xlu1 %1080 }
 0x2f1   : > { %v1261_v1 = vld [vmem:[#allocation1] sm:$0xff]  ;;  %v1134_v43 = vperm.slane %v1075_v13, 0  ;;  %v1135_v44 = vperm.slane %v1075_v13, 1  ;;  %v1136_v57 = vperm.slane %v1075_v13, 2  ;;  %v1137_v33 = vperm.slane %v1075_v13, 3 }
 0x2f2   : > { %1262 = vst [vmem:[#allocation1] ss:$9 sm:$0xff] %v1126_v35  ;;  %1398 = vperm.xlu0 %1823, %v1261_v1   ;;  %v1138_v45 = vperm.slane %v1075_v13, 4  ;;  %v1139_v27 = vperm.slane %v1075_v13, 5  ;;  %v1140_v39 = vperm.slane %v1075_v13, 6  ;;  %v1141_v11 = vperm.slane %v1075_v13, 7 }
 0x2f3   : > { %1263 = vst [vmem:[#allocation1 + $0x1] ss:$9 sm:$0xff] %v1127_v38  ;;  %v1158_v24 = vperm.slane %v1081_v60, 0  ;;  %v1159_v47 = vperm.slane %v1081_v60, 1  ;;  %v1160_v61 = vperm.slane %v1081_v60, 2  ;;  %v1161_v62 = vperm.slane %v1081_v60, 3 }
 0x2f4   : > { %1264 = vst [vmem:[#allocation1 + $0x2] ss:$9 sm:$0xff] %v1128_v25  ;;  %v1162_v22 = vperm.slane %v1081_v60, 4  ;;  %v1163_v34 = vperm.slane %v1081_v60, 5  ;;  %v1164_v52 = vperm.slane %v1081_v60, 6  ;;  %v1165_v63 = vperm.slane %v1081_v60, 7 }
 0x2f5   : > { %1265 = vst [vmem:[#allocation1 + $0x3] ss:$9 sm:$0xff] %v1129_v37 }
 0x2f6   : > { %1266 = vst [vmem:[#allocation1 + $0x4] ss:$9 sm:$0xff] %v1130_v42 }
 0x2f7   : > { %1267 = vst [vmem:[#allocation1 + $0x5] ss:$9 sm:$0xff] %v1131_v40 }
 0x2f8   : > { %1268 = vst [vmem:[#allocation1 + $0x6] ss:$9 sm:$0xff] %v1132_v16  ;;  %v1077_v12 = vpop.xlane.xlu2 %1076  ;;  %v1085_v3 = vpop.xlane.xlu0 %1084 }
 0x2f9   : > { %1269 = vst [vmem:[#allocation1 + $0x7] ss:$9 sm:$0xff] %v1133_v28  ;;  %v1142_v0 = vperm.slane %v1077_v12, 0  ;;  %v1143_v46 = vperm.slane %v1077_v12, 1  ;;  %v1144_v21 = vperm.slane %v1077_v12, 2  ;;  %v1145_v49 = vperm.slane %v1077_v12, 3  ;;  %v1087_v42 = vpop.xlane.xlu1 %1086 }
 0x2fa   : > { %v1146_v20 = vperm.slane %v1077_v12, 4  ;;  %v1147_v50 = vperm.slane %v1077_v12, 5  ;;  %v1148_v29 = vperm.slane %v1077_v12, 6  ;;  %v1149_v53 = vperm.slane %v1077_v12, 7 }
 0x2fb   : > { %v1174_v23 = vperm.slane %v1085_v3, 0  ;;  %v1175_v32 = vperm.slane %v1085_v3, 1  ;;  %v1176_v31 = vperm.slane %v1085_v3, 2  ;;  %v1177_v35 = vperm.slane %v1085_v3, 3 }
 0x2fc   : > { %v1178_v38 = vperm.slane %v1085_v3, 4  ;;  %v1179_v25 = vperm.slane %v1085_v3, 5  ;;  %v1180_v1 = vperm.slane %v1085_v3, 6  ;;  %v1181_v37 = vperm.slane %v1085_v3, 7 }
 0x2fd   : > { %v1182_v40 = vperm.slane %v1087_v42, 0  ;;  %v1183_v16 = vperm.slane %v1087_v42, 1  ;;  %v1184_v28 = vperm.slane %v1087_v42, 2 }
 0x300   : > { %v1270_v6 = vld [vmem:[#allocation1] sm:$0xff]  ;;  %v1083_v26 = vpop.xlane.xlu2 %1082 }
 0x301   : > { %1271 = vst [vmem:[#allocation1] ss:$9 sm:$0xff] %v1134_v43  ;;  %1401 = vperm.xlu1 %1824, %v1270_v6   ;;  %v1166_v4 = vperm.slane %v1083_v26, 0  ;;  %v1167_v51 = vperm.slane %v1083_v26, 1  ;;  %v1168_v2 = vperm.slane %v1083_v26, 2  ;;  %v1169_v8 = vperm.slane %v1083_v26, 3 }
 0x302   : > { %1272 = vst [vmem:[#allocation1 + $0x1] ss:$9 sm:$0xff] %v1135_v44  ;;  %v1170_v7 = vperm.slane %v1083_v26, 4  ;;  %v1171_v9 = vperm.slane %v1083_v26, 5  ;;  %v1172_v17 = vperm.slane %v1083_v26, 6  ;;  %v1173_v5 = vperm.slane %v1083_v26, 7 }
 0x303   : > { %1273 = vst [vmem:[#allocation1 + $0x2] ss:$9 sm:$0xff] %v1136_v57  ;;  %v1185_v43 = vperm.slane %v1087_v42, 3  ;;  %v1186_v44 = vperm.slane %v1087_v42, 4  ;;  %v1187_v57 = vperm.slane %v1087_v42, 5  ;;  %v1188_v6 = vperm.slane %v1087_v42, 6 }
 0x304   : > { %1274 = vst [vmem:[#allocation1 + $0x3] ss:$9 sm:$0xff] %v1137_v33  ;;  %v1189_v33 = vperm.slane %v1087_v42, 7 }
 0x305   : > { %1275 = vst [vmem:[#allocation1 + $0x4] ss:$9 sm:$0xff] %v1138_v45 }
 0x306   : > { %1276 = vst [vmem:[#allocation1 + $0x5] ss:$9 sm:$0xff] %v1139_v27 }
 0x307   : > { %1277 = vst [vmem:[#allocation1 + $0x6] ss:$9 sm:$0xff] %v1140_v39 }
 0x308   : > { %1278 = vst [vmem:[#allocation1 + $0x7] ss:$9 sm:$0xff] %v1141_v11  ;;  %v1089_v45 = vpop.xlane.xlu2 %1088 }
 0x309   : > { %v1190_v27 = vperm.slane %v1089_v45, 0  ;;  %v1191_v39 = vperm.slane %v1089_v45, 1  ;;  %v1192_v12 = vperm.slane %v1089_v45, 2 }
 0x30f   : > { %v1279_v48 = vld [vmem:[#allocation1] sm:$0xff] }
 0x310   : > { %1280 = vst [vmem:[#allocation1] ss:$9 sm:$0xff] %v1142_v0  ;;  %1404 = vperm.xlu2 %1825, %v1279_v48   ;;  %v1193_v0 = vperm.slane %v1089_v45, 3  ;;  %v1196_v48 = vperm.slane %v1089_v45, 6 }
 0x311   : > { %1281 = vst [vmem:[#allocation1 + $0x1] ss:$9 sm:$0xff] %v1143_v46  ;;  %v1194_v46 = vperm.slane %v1089_v45, 4 }
 0x312   : > { %1282 = vst [vmem:[#allocation1 + $0x2] ss:$9 sm:$0xff] %v1144_v21  ;;  %v1195_v21 = vperm.slane %v1089_v45, 5 }
 0x313   : > { %1283 = vst [vmem:[#allocation1 + $0x3] ss:$9 sm:$0xff] %v1145_v49  ;;  %v1197_v49 = vperm.slane %v1089_v45, 7 }
 0x314   : > { %1284 = vst [vmem:[#allocation1 + $0x4] ss:$9 sm:$0xff] %v1146_v20  ;;  %v1091_v20 = vpop.xlane.xlu0 %1090 }
 0x315   : > { %1285 = vst [vmem:[#allocation1 + $0x5] ss:$9 sm:$0xff] %v1147_v50  ;;  %v1198_v50 = vperm.slane %v1091_v20, 0  ;;  %v1201_v54 = vperm.slane %v1091_v20, 3 }
 0x316   : > { %1286 = vst [vmem:[#allocation1 + $0x6] ss:$9 sm:$0xff] %v1148_v29  ;;  %v1199_v29 = vperm.slane %v1091_v20, 1 }
 0x317   : > { %1287 = vst [vmem:[#allocation1 + $0x7] ss:$9 sm:$0xff] %v1149_v53  ;;  %v1200_v53 = vperm.slane %v1091_v20, 2 }
 0x31e   : > { %v1288_v56 = vld [vmem:[#allocation1] sm:$0xff] }
 0x31f   : > { %1289 = vst [vmem:[#allocation1] ss:$9 sm:$0xff] %v1150_v55  ;;  %1407 = vperm.xlu1 %1824, %v1288_v56   ;;  %v1203_v56 = vperm.slane %v1091_v20, 5 }
 0x320   : > { %1290 = vst [vmem:[#allocation1 + $0x1] ss:$9 sm:$0xff] %v1151_v14  ;;  %v1202_v14 = vperm.slane %v1091_v20, 4 }
 0x321   : > { %1291 = vst [vmem:[#allocation1 + $0x2] ss:$9 sm:$0xff] %v1152_v19  ;;  %v2390_v19 = vpop.xlane.xlu1 %1098 }
 0x322   : > { %1292 = vst [vmem:[#allocation1 + $0x3] ss:$9 sm:$0xff] %v1153_v15  ;;  %v1204_v15 = vperm.slane %v1091_v20, 6  ;;  %v1232_v42 = vperm.slane %v2390_v19, 2 }
 0x323   : > { %1293 = vst [vmem:[#allocation1 + $0x4] ss:$9 sm:$0xff] %v1154_v58  ;;  %v1205_v58 = vperm.slane %v1091_v20, 7 }
 0x324   : > { %1294 = vst [vmem:[#allocation1 + $0x5] ss:$9 sm:$0xff] %v1155_v59 }
 0x325   : > { %1295 = vst [vmem:[#allocation1 + $0x6] ss:$9 sm:$0xff] %v1156_v36 }
 0x326   : > { %1296 = vst [vmem:[#allocation1 + $0x7] ss:$9 sm:$0xff] %v1157_v18 }
 0x329   : > { %v1093_v59 = vpop.xlane.xlu1 %1092 }
 0x32a   : > { %v1206_v36 = vperm.slane %v1093_v59, 0  ;;  %v1207_v18 = vperm.slane %v1093_v59, 1 }
 0x32d   : > { %v1297_v30 = vld [vmem:[#allocation1] sm:$0xff] }
 0x32e   : > { %1298 = vst [vmem:[#allocation1] ss:$9 sm:$0xff] %v1158_v24  ;;  %1410 = vperm.xlu2 %1825, %v1297_v30   ;;  %v1208_v24 = vperm.slane %v1093_v59, 2  ;;  %v1209_v30 = vperm.slane %v1093_v59, 3 }
 0x32f   : > { %1299 = vst [vmem:[#allocation1 + $0x1] ss:$9 sm:$0xff] %v1159_v47  ;;  %v1210_v47 = vperm.slane %v1093_v59, 4 }
 0x330   : > { %1300 = vst [vmem:[#allocation1 + $0x2] ss:$9 sm:$0xff] %v1160_v61  ;;  %v1211_v61 = vperm.slane %v1093_v59, 5 }
 0x331   : > { %1301 = vst [vmem:[#allocation1 + $0x3] ss:$9 sm:$0xff] %v1161_v62  ;;  %v1212_v62 = vperm.slane %v1093_v59, 6 }
 0x332   : > { %1302 = vst [vmem:[#allocation1 + $0x4] ss:$9 sm:$0xff] %v1162_v22  ;;  %v1213_v22 = vperm.slane %v1093_v59, 7 }
 0x333   : > { %1303 = vst [vmem:[#allocation1 + $0x5] ss:$9 sm:$0xff] %v1163_v34  ;;  %v1095_v34 = vpop.xlane.xlu2 %1094 }
 0x334   : > { %1304 = vst [vmem:[#allocation1 + $0x6] ss:$9 sm:$0xff] %v1164_v52  ;;  %v1214_v52 = vperm.slane %v1095_v34, 0 }
 0x335   : > { %1305 = vst [vmem:[#allocation1 + $0x7] ss:$9 sm:$0xff] %v1165_v63  ;;  %v1215_v63 = vperm.slane %v1095_v34, 1 }
 0x33c   : > { %v1306_v41 = vld [vmem:[#allocation1] sm:$0xff] }
 0x33d   : > { %1307 = vst [vmem:[#allocation1] ss:$9 sm:$0xff] %v1166_v4  ;;  %1413 = vperm.xlu1 %1824, %v1306_v41   ;;  %v1216_v4 = vperm.slane %v1095_v34, 2  ;;  %v1219_v41 = vperm.slane %v1095_v34, 5 }
 0x33e   : > { %1308 = vst [vmem:[#allocation1 + $0x1] ss:$9 sm:$0xff] %v1167_v51  ;;  %v1217_v51 = vperm.slane %v1095_v34, 3 }
 0x33f   : > { %1309 = vst [vmem:[#allocation1 + $0x2] ss:$9 sm:$0xff] %v1168_v2  ;;  %v1218_v2 = vperm.slane %v1095_v34, 4 }
 0x340   : > { %1310 = vst [vmem:[#allocation1 + $0x3] ss:$9 sm:$0xff] %v1169_v8  ;;  %v1220_v8 = vperm.slane %v1095_v34, 6 }
 0x341   : > { %1311 = vst [vmem:[#allocation1 + $0x4] ss:$9 sm:$0xff] %v1170_v7  ;;  %v1221_v7 = vperm.slane %v1095_v34, 7 }
 0x342   : > { %1312 = vst [vmem:[#allocation1 + $0x5] ss:$9 sm:$0xff] %v1171_v9  ;;  %v1097_v9 = vpop.xlane.xlu0 %1096 }
 0x343   : > { %1313 = vst [vmem:[#allocation1 + $0x6] ss:$9 sm:$0xff] %v1172_v17  ;;  %v1222_v17 = vperm.slane %v1097_v9, 0 }
 0x344   : > { %1314 = vst [vmem:[#allocation1 + $0x7] ss:$9 sm:$0xff] %v1173_v5  ;;  %v1223_v5 = vperm.slane %v1097_v9, 1 }
 0x34b   : > { %v1315_v10 = vld [vmem:[#allocation1] sm:$0xff] }
 0x34c   : > { %1316 = vst [vmem:[#allocation1] ss:$9 sm:$0xff] %v1174_v23  ;;  %1416 = vperm.xlu2 %1825, %v1315_v10   ;;  %v1224_v23 = vperm.slane %v1097_v9, 2  ;;  %v1226_v10 = vperm.slane %v1097_v9, 4 }
 0x34d   : > { %1317 = vst [vmem:[#allocation1 + $0x1] ss:$9 sm:$0xff] %v1175_v32  ;;  %v1225_v32 = vperm.slane %v1097_v9, 3 }
 0x34e   : > { %1318 = vst [vmem:[#allocation1 + $0x2] ss:$9 sm:$0xff] %v1176_v31  ;;  %v1227_v31 = vperm.slane %v1097_v9, 5 }
 0x34f   : > { %1319 = vst [vmem:[#allocation1 + $0x3] ss:$9 sm:$0xff] %v1177_v35  ;;  %v1228_v35 = vperm.slane %v1097_v9, 6 }
 0x350   : > { %1320 = vst [vmem:[#allocation1 + $0x4] ss:$9 sm:$0xff] %v1178_v38  ;;  %v1229_v38 = vperm.slane %v1097_v9, 7 }
 0x351   : > { %1321 = vst [vmem:[#allocation1 + $0x5] ss:$9 sm:$0xff] %v1179_v25  ;;  %v1230_v25 = vperm.slane %v2390_v19, 0 }
 0x352   : > { %1322 = vst [vmem:[#allocation1 + $0x6] ss:$9 sm:$0xff] %v1180_v1  ;;  %v1231_v1 = vperm.slane %v2390_v19, 1 }
 0x353   : > { %1323 = vst [vmem:[#allocation1 + $0x7] ss:$9 sm:$0xff] %v1181_v37 }
 0x35a   : > { %v1324_v13 = vld [vmem:[#allocation1] sm:$0xff] }
 0x35b   : > { %1325 = vst [vmem:[#allocation1] ss:$9 sm:$0xff] %v1182_v40  ;;  %1419 = vperm.xlu0 %1823, %v1324_v13   ;;  %v1233_v40 = vperm.slane %v2390_v19, 3  ;;  %v1236_v13 = vperm.slane %v2390_v19, 6 }
 0x35c   : > { %1326 = vst [vmem:[#allocation1 + $0x1] ss:$9 sm:$0xff] %v1183_v16  ;;  %v1234_v16 = vperm.slane %v2390_v19, 4 }
 0x35d   : > { %1327 = vst [vmem:[#allocation1 + $0x2] ss:$9 sm:$0xff] %v1184_v28  ;;  %v1235_v28 = vperm.slane %v2390_v19, 5 }
 0x35e   : > { %1328 = vst [vmem:[#allocation1 + $0x3] ss:$9 sm:$0xff] %v1185_v43  ;;  %v1237_v43 = vperm.slane %v2390_v19, 7 }
 0x35f   : > { %1329 = vst [vmem:[#allocation1 + $0x4] ss:$9 sm:$0xff] %v1186_v44  ;;  %v1101_v44 = vpop.xlane.xlu2 %1100 }
 0x360   : > { %1330 = vst [vmem:[#allocation1 + $0x5] ss:$9 sm:$0xff] %v1187_v57  ;;  %v1238_v57 = vperm.slane %v1101_v44, 0  ;;  %v1240_v45 = vperm.slane %v1101_v44, 2 }
 0x361   : > { %1331 = vst [vmem:[#allocation1 + $0x6] ss:$9 sm:$0xff] %v1188_v6  ;;  %v1239_v6 = vperm.slane %v1101_v44, 1 }
 0x362   : > { %1332 = vst [vmem:[#allocation1 + $0x7] ss:$9 sm:$0xff] %v1189_v33 }
 0x369   : > { %v1333_v11 = vld [vmem:[#allocation1] sm:$0xff] }
 0x36a   : > { %1334 = vst [vmem:[#allocation1] ss:$9 sm:$0xff] %v1190_v27  ;;  %1422 = vperm.xlu1 %1824, %v1333_v11   ;;  %v1241_v27 = vperm.slane %v1101_v44, 3  ;;  %v1243_v11 = vperm.slane %v1101_v44, 5 }
 0x36b   : > { %1335 = vst [vmem:[#allocation1 + $0x1] ss:$9 sm:$0xff] %v1191_v39  ;;  %v1242_v39 = vperm.slane %v1101_v44, 4 }
 0x36c   : > { %1336 = vst [vmem:[#allocation1 + $0x2] ss:$9 sm:$0xff] %v1192_v12  ;;  %v1244_v12 = vperm.slane %v1101_v44, 6 }
 0x36d   : > { %1337 = vst [vmem:[#allocation1 + $0x3] ss:$9 sm:$0xff] %v1193_v0  ;;  %v1245_v0 = vperm.slane %v1101_v44, 7 }
 0x36e   : > { %1338 = vst [vmem:[#allocation1 + $0x4] ss:$9 sm:$0xff] %v1194_v46 }
 0x36f   : > { %1339 = vst [vmem:[#allocation1 + $0x5] ss:$9 sm:$0xff] %v1195_v21  ;;  %v1405_v21 = vpop.permute.xlu2 %1404 }
 0x370   : > { %1340 = vst [vmem:[#allocation1 + $0x6] ss:$9 sm:$0xff] %v1196_v48 }
 0x371   : > { %1341 = vst [vmem:[#allocation1 + $0x7] ss:$9 sm:$0xff] %v1197_v49  ;;  %v1445_v49 = vlaneseq }
 0x373   : > { %v1402_v48 = vpop.permute.xlu1 %1401 }
 0x378   : > { %v1342_v55 = vld [vmem:[#allocation1] sm:$0xff] }
 0x379   : > { %1425 = vperm.xlu2 %1825, %v1342_v55   ;;  %1343 = vst [vmem:[#allocation1] ss:$9 sm:$0xff] %v1198_v50 }
 0x37a   : > { %1344 = vst [vmem:[#allocation1 + $0x1] ss:$9 sm:$0xff] %v1199_v29  ;;  %v1446_v29 = vand.u32 127, %v1445_v49 }
 0x37b   : > { %1345 = vst [vmem:[#allocation1 + $0x2] ss:$9 sm:$0xff] %v1200_v53  ;;  %v1399_v53 = vpop.permute.xlu0 %1398 }
 0x37c   : > { %1346 = vst [vmem:[#allocation1 + $0x3] ss:$9 sm:$0xff] %v1201_v54  ;;  %v1448_v54 = vadd.s32 4294967288, %v1446_v29  ;;  %v1504_v44 = vadd.s32 4294967176, %v1446_v29 }
 0x37d   : > { %1347 = vst [vmem:[#allocation1 + $0x4] ss:$9 sm:$0xff] %v1202_v14 }
 0x37e   : > { %1348 = vst [vmem:[#allocation1 + $0x5] ss:$9 sm:$0xff] %v1203_v56  ;;  %v1449_v19 = vperm.slane %v1402_v48, %v1448_v54  ;;  %v1456_v56 = vadd.s32 4294967272, %v1446_v29 }
 0x37f   : > { %1349 = vst [vmem:[#allocation1 + $0x6] ss:$9 sm:$0xff] %v1204_v15  ;;  %v1452_v15 = vadd.s32 4294967280, %v1446_v29 }
 0x380   : > { %1350 = vst [vmem:[#allocation1 + $0x7] ss:$9 sm:$0xff] %v1205_v58  ;;  %v1447_v58 = vperm.slane %v1399_v53, %v1446_v29 }
 0x387   : > { %v1351_v60 = vld [vmem:[#allocation1] sm:$0xff] }
 0x388   : > { %1428 = vperm.xlu0 %1823, %v1351_v60   ;;  %1352 = vst [vmem:[#allocation1] ss:$9 sm:$0xff] %v1206_v36  ;;  %v1411_v20 = vpop.permute.xlu2 %1410  ;;  %v1451_v36 = vsel %vm1450_vm4, %v1449_v19, %v1447_v58  ;;  %v1464_v60 = vadd.s32 4294967256, %v1446_v29 }
 0x389   : > { %1353 = vst [vmem:[#allocation1 + $0x1] ss:$9 sm:$0xff] %v1207_v18 }
 0x38a   : > { %1354 = vst [vmem:[#allocation1 + $0x2] ss:$9 sm:$0xff] %v1208_v24  ;;  %v1453_v24 = vperm.slane %v1405_v21, %v1452_v15 }
 0x38b   : > { %1355 = vst [vmem:[#allocation1 + $0x3] ss:$9 sm:$0xff] %v1209_v30  ;;  %v1460_v30 = vadd.s32 4294967264, %v1446_v29 }
 0x38c   : > { %1356 = vst [vmem:[#allocation1 + $0x4] ss:$9 sm:$0xff] %v1210_v47  ;;  %v1455_v47 = vsel %vm1454_vm2, %v1453_v24, %v1451_v36 }
 0x38d   : > { %1357 = vst [vmem:[#allocation1 + $0x5] ss:$9 sm:$0xff] %v1211_v61 }
 0x38e   : > { %1358 = vst [vmem:[#allocation1 + $0x6] ss:$9 sm:$0xff] %v1212_v62 }
 0x38f   : > { %1359 = vst [vmem:[#allocation1 + $0x7] ss:$9 sm:$0xff] %v1213_v22 }
 0x391   : > { %v1408_v50 = vpop.permute.xlu1 %1407 }
 0x392   : > { %v1457_v18 = vperm.slane %v1408_v50, %v1456_v56 }
 0x394   : > { %v1459_v22 = vsel %vm1458_vm13, %v1457_v18, %v1455_v47 }
 0x396   : > { %v1360_v26 = vld [vmem:[#allocation1] sm:$0xff] }
 0x397   : > { %1431 = vperm.xlu1 %1824, %v1360_v26   ;;  %1361 = vst [vmem:[#allocation1] ss:$9 sm:$0xff] %v1214_v52  ;;  %v1472_v52 = vadd.s32 4294967240, %v1446_v29  ;;  %v1468_v26 = vadd.s32 4294967248, %v1446_v29 }
 0x398   : > { %1362 = vst [vmem:[#allocation1 + $0x1] ss:$9 sm:$0xff] %v1215_v63  ;;  %v1461_v63 = vperm.slane %v1411_v20, %v1460_v30 }
 0x399   : > { %1363 = vst [vmem:[#allocation1 + $0x2] ss:$9 sm:$0xff] %v1216_v4  ;;  %v1476_v4 = vadd.s32 4294967232, %v1446_v29 }
 0x39a   : > { %1364 = vst [vmem:[#allocation1 + $0x3] ss:$9 sm:$0xff] %v1217_v51  ;;  %v1463_v51 = vsel %vm1462_vm7, %v1461_v63, %v1459_v22 }
 0x39b   : > { %1365 = vst [vmem:[#allocation1 + $0x4] ss:$9 sm:$0xff] %v1218_v2 }
 0x39c   : > { %1366 = vst [vmem:[#allocation1 + $0x5] ss:$9 sm:$0xff] %v1219_v41 }
 0x39d   : > { %1367 = vst [vmem:[#allocation1 + $0x6] ss:$9 sm:$0xff] %v1220_v8 }
 0x39e   : > { %1368 = vst [vmem:[#allocation1 + $0x7] ss:$9 sm:$0xff] %v1221_v7 }
 0x3a5   : > { %v1369_v3 = vld [vmem:[#allocation1] sm:$0xff] }
 0x3a6   : > { %1434 = vperm.xlu2 %1825, %v1369_v3   ;;  %1370 = vst [vmem:[#allocation1] ss:$9 sm:$0xff] %v1222_v17  ;;  %v1417_v55 = vpop.permute.xlu2 %1416  ;;  %v1484_v17 = vadd.s32 4294967216, %v1446_v29  ;;  %v1488_v3 = vadd.s32 4294967208, %v1446_v29 }
 0x3a7   : > { %1371 = vst [vmem:[#allocation1 + $0x1] ss:$9 sm:$0xff] %v1223_v5  ;;  %v1469_v7 = vperm.slane %v1417_v55, %v1468_v26  ;;  %v1480_v5 = vadd.s32 4294967224, %v1446_v29 }
 0x3a8   : > { %1372 = vst [vmem:[#allocation1 + $0x2] ss:$9 sm:$0xff] %v1224_v23 }
 0x3a9   : > { %1373 = vst [vmem:[#allocation1 + $0x3] ss:$9 sm:$0xff] %v1225_v32 }
 0x3aa   : > { %1374 = vst [vmem:[#allocation1 + $0x4] ss:$9 sm:$0xff] %v1226_v10 }
 0x3ab   : > { %1375 = vst [vmem:[#allocation1 + $0x5] ss:$9 sm:$0xff] %v1227_v31 }
 0x3ac   : > { %1376 = vst [vmem:[#allocation1 + $0x6] ss:$9 sm:$0xff] %v1228_v35 }
 0x3ad   : > { %1377 = vst [vmem:[#allocation1 + $0x7] ss:$9 sm:$0xff] %v1229_v38 }
 0x3af   : > { %v1414_v14 = vpop.permute.xlu1 %1413 }
 0x3b0   : > { %v1465_v34 = vperm.slane %v1414_v14, %v1464_v60 }
 0x3b2   : > { %v1467_v41 = vsel %vm1466_vm9, %v1465_v34, %v1463_v51 }
 0x3b3   : > { %v1471_v23 = vsel %vm1470_vm1, %v1469_v7, %v1467_v41 }
 0x3b4   : > { %v1378_v37 = vld [vmem:[#allocation1] sm:$0xff] }
 0x3b5   : > { %1437 = vperm.xlu0 %1823, %v1378_v37   ;;  %1379 = vst [vmem:[#allocation1] ss:$9 sm:$0xff] %v1230_v25  ;;  %v1496_v37 = vadd.s32 4294967192, %v1446_v29 }
 0x3b6   : > { %1380 = vst [vmem:[#allocation1 + $0x1] ss:$9 sm:$0xff] %v1231_v1 }
 0x3b7   : > { %1381 = vst [vmem:[#allocation1 + $0x2] ss:$9 sm:$0xff] %v1232_v42  ;;  %v1492_v42 = vadd.s32 4294967200, %v1446_v29 }
 0x3b8   : > { %1382 = vst [vmem:[#allocation1 + $0x3] ss:$9 sm:$0xff] %v1233_v40 }
 0x3b9   : > { %1383 = vst [vmem:[#allocation1 + $0x4] ss:$9 sm:$0xff] %v1234_v16 }
 0x3ba   : > { %1384 = vst [vmem:[#allocation1 + $0x5] ss:$9 sm:$0xff] %v1235_v28 }
 0x3bb   : > { %1385 = vst [vmem:[#allocation1 + $0x6] ss:$9 sm:$0xff] %v1236_v13  ;;  %v1500_v13 = vadd.s32 4294967184, %v1446_v29 }
 0x3bc   : > { %1386 = vst [vmem:[#allocation1 + $0x7] ss:$9 sm:$0xff] %v1237_v43 }
 0x3c3   : > { %v1387_v33 = vld [vmem:[#allocation1] sm:$0xff] }
 0x3c4   : > { %1440 = vperm.xlu1 %1824, %v1387_v33   ;;  %1388 = vst [vmem:[#allocation1] ss:$9 sm:$0xff] %v1238_v57 }
 0x3c5   : > { %1389 = vst [vmem:[#allocation1 + $0x1] ss:$9 sm:$0xff] %v1239_v6 }
 0x3c6   : > { %1390 = vst [vmem:[#allocation1 + $0x2] ss:$9 sm:$0xff] %v1240_v45 }
 0x3c7   : > { %1391 = vst [vmem:[#allocation1 + $0x3] ss:$9 sm:$0xff] %v1241_v27 }
 0x3c8   : > { %1392 = vst [vmem:[#allocation1 + $0x4] ss:$9 sm:$0xff] %v1242_v39 }
 0x3c9   : > { %1393 = vst [vmem:[#allocation1 + $0x5] ss:$9 sm:$0xff] %v1243_v11 }
 0x3ca   : > { %1394 = vst [vmem:[#allocation1 + $0x6] ss:$9 sm:$0xff] %v1244_v12 }
 0x3cb   : > { %1395 = vst [vmem:[#allocation1 + $0x7] ss:$9 sm:$0xff] %v1245_v0  ;;  %v1069_v0 = vld [vmem:[%s2049_s9] sm:$0x1] }
 0x3cd   : > { %v1420_v59 = vpop.permute.xlu0 %1419 }
 0x3ce   : > { %v1473_v8 = vperm.slane %v1420_v59, %v1472_v52 }
 0x3d0   : > { %v1475_v31 = vsel %vm1474_vm11, %v1473_v8, %v1471_v23 }
 0x3d2   : > { %v1396_v46 = vld [vmem:[#allocation1] sm:$0xff] }
 0x3d3   : > { %1443 = vperm.xlu2 %1825, %v1396_v46   ;;  %v1426_v61 = vpop.permute.xlu2 %1425 }
 0x3d4   : > { %v1481_v25 = vperm.slane %v1426_v61, %v1480_v5 }
 0x3dc   : > { %v1423_v62 = vpop.permute.xlu1 %1422 }
 0x3dd   : > { %v1477_v9 = vperm.slane %v1423_v62, %v1476_v4 }
 0x3df   : > { %v1479_v35 = vsel %vm1478_vm12, %v1477_v9, %v1475_v31 }
 0x3e0   : > { %v1483_v16 = vsel %vm1482_vm5, %v1481_v25, %v1479_v35 }
 0x3fa   : > { %v1429_v2 = vpop.permute.xlu0 %1428 }
 0x3fb   : > { %v1485_v38 = vperm.slane %v1429_v2, %v1484_v17 }
 0x3fd   : > { %v1487_v28 = vsel %vm1486_vm8, %v1485_v38, %v1483_v16 }
 0x400   : > { %v1435_v32 = vpop.permute.xlu2 %1434 }
 0x401   : > { %v1493_v6 = vperm.slane %v1435_v32, %v1492_v42 }
 0x409   : > { %v1432_v10 = vpop.permute.xlu1 %1431 }
 0x40a   : > { %v1489_v1 = vperm.slane %v1432_v10, %v1488_v3 }
 0x40c   : > { %v1491_v43 = vsel %vm1490_vm10, %v1489_v1, %v1487_v28 }
 0x40d   : > { %v1495_v27 = vsel %vm1494_vm14, %v1493_v6, %v1491_v43 }
 0x427   : > { %v1438_v40 = vpop.permute.xlu0 %1437 }
 0x428   : > { %v1497_v57 = vperm.slane %v1438_v40, %v1496_v37 }
 0x42a   : > { %v1499_v12 = vsel %vm1498_vm15, %v1497_v57, %v1495_v27 }
 0x42d   : > { %v1444_v33 = vpop.permute.xlu2 %1443 }
 0x42e   : > { %v1505_v11 = vperm.slane %v1444_v33, %v1504_v44 }
 0x436   : > { %v1441_v45 = vpop.permute.xlu1 %1440 }
 0x437   : > { %v1501_v39 = vperm.slane %v1441_v45, %v1500_v13 }
 0x439   : > { %v1503_v46 = vsel %vm1502_vm0, %v1501_v39, %v1499_v12  ;;  %1514 = sbr.rel (%p1647_p0) target bundleno = 1096 (0x448), region = 40 }
 0x43a   : > { %v1507_v21 = vsel %vm1506_vm6, %v1505_v11, %v1503_v46 }
 0x43b   : > { %v1509_v48 = vadd.f32 %v1507_v21, %v1069_v0 }
 0x43d   : > { %1510 = vst [vmem:[%s2049_s9] sm:$0x1] %v1509_v48 }
 0x444   : > { %v1515_v49 = vld [vmem:[%s2049_s9] sm:$0x1] }
 0x445   : > { %v1516_v20 = vmul.f32 0.00390625, %v1515_v49 }
 0x447   : > { %1517 = vst [vmem:[%s2049_s9] sm:$0x1] %v1516_v20 }
 0x448 PF: > { %s1527_s21 = scalar_lea.hbm %s2453_s3, %s1908_s16  ;;  %s1529_s26 = sshll.u32 %s2049_s9, 4  ;;  %s1530_s26 = int_to_ptr.vmem [resolvable:$true] %s1529_s26 }
 0x449   : > { %s1531_s27 = sshll.u32 %s1527_s21, 4  ;;  %s1519_s15 = scalar_lea.sflag [#allocation3], %s181_s29  ;;  %s1532_s27 = int_to_ptr.hbm [resolvable:$true] %s1531_s27 }
 0x44a   : > { %s1840_s4 = sshra.s32 %s1532_s27, 4  ;;  %s1846_s5 = scalar_lea.hbm %s2453_s3, 2  ;;  %s1841_s4 = int_to_ptr.hbm [resolvable:$true] %s1840_s4 }
 0x44b   : > { %s1842_s8 = scalar_lea.hbm %s1841_s4, 1  ;;  %p1847_p5 = scmp.lt.s32.totalorder %s1841_s4, %s2453_s3 }
 0x44c   : > { %p1843_p1 = scmp.ne.s32.totalorder %s1841_s4, %s1842_s8  ;;  %p1848_p6 = scmp.lt.s32.totalorder %s1846_s5, %s1842_s8 }
 0x44e   : > { %p1844_p2 = pnand %p1843_p1, %p2019_p3  ;;  %p1849_p7 = por %p1848_p6, %p1847_p5 }
 0x450   : > { %p1845_p4 = pneg %p1844_p2 }
 0x452   : > { %p1850_p8 = pnand %p1849_p7, %p1845_p4 }
 0x454   : > { %1853 = shalt.err (!%p1850_p8)
}
 0x455   : > { %1664 = dma.vmem_to_hbm [thread:$0]  (%p2019_p3), %s1530_s26, 16, %s1532_s27, %s1519_s15  }
 0x456 PF: > { %p1670_p10 = scmp.ge.s32.totalorder %s1920_s19, 2  ;;  %s1543_s16 = sand.u32 1, %s1892_s12  }
 0x457   : > { %s1544_s29 = scalar_lea.sflag [#allocation3], %s1543_s16 }
 0x458   : > { %p1667_p11 = pnand %p1670_p10, %p2029_p9 }
 0x45a   : > { %p1668_p12 = pneg %p1667_p11 }
 0x45c   : > { %1887 = dma.done.wait (%p1668_p12), %s1544_s29, 16  }
 0x45d   : > { %1889 = vsyncadd (%p1668_p12), %s1544_s29, 4294967280  ;;  %s16_s19 = sadd.s32 1, %s1920_s19   ;;  %s2479_s12 = smov %s1896_s13 }
 0x45e   : > { %p13_p13 = scmp.ge.s32.totalorder %s16_s19, 6   ;;  %s2480_s13 = smov %s1900_s14 }
 0x45f   : > { %s2481_s14 = smov %s2037_s28  ;;  %s2482_s15 = smov %s1912_s17 }
 0x460   : > { %s2483_s16 = smov %s1916_s18  ;;  %s2484_s17 = smov %s2487_s22 }
 0x461   : > { %s2485_s18 = smov %s2491_s23  ;;  %15 = sbr.rel (!%p13_p13) target bundleno = 5 (0x5), region = 85 }
 0x466   :  { %1549 = vsyncpa [#allocation3], 1 }
 0x467   :  { %1551 = vsyncpa [#allocation3 + $0x1], 1 }

</bundles_post_ra>
